<compile_context>
chip_gen: v6e
topology: v6e:2x2x1
jax: 0.10.0
libtpu: 0.0.40
codegen_flags: <defaults>
</compile_context>

<pallas_src>
import math

import jax
import jax.numpy as jnp
import numpy as np
from jax.experimental import pallas as pl
from jax.experimental.pallas import tpu as pltpu

EPS = 1e-5


# ---------------------------------------------------------------------------
# Pallas kernel: one (batch, row-block) tile per grid step.
# ---------------------------------------------------------------------------
def basic_block1_kernel(
    x_ref,     # (1, 1, R, Cin)   bf16, R = (TH+2)*W rows incl. 1-row halo each side
    w14_ref,   # (Cin, Cmid+Cout_p) bf16  [conv1*bn1 | conv4*bn4 (padded)]
    b14_ref,   # (1, Cmid+Cout_p) f32
    w2_ref,    # (3, 3*Cmid, Cmid) bf16  conv2*bn2, one K=192 block per ky
    b2_ref,    # (1, Cmid)        f32
    w3_ref,    # (Cmid, Cout_p)   bf16  conv3*bn3 (padded)
    b3_ref,    # (1, Cout_p)      f32
    o_ref,     # (1, 1, M, Cout_p) f32, M = TH*W
):
    i = pl.program_id(1)
    n_rb = pl.num_programs(1)

    R = x_ref.shape[2]
    M = o_ref.shape[2]
    W = (R - M) // 2
    Cmid = w2_ref.shape[2]

    # ---- stage A: conv1 & conv4 (1x1, BN folded) as one bf16 matmul ---------
    xall = x_ref[0, 0]                                           # (R, Cin) bf16
    y = jnp.dot(xall, w14_ref[...], preferred_element_type=jnp.float32)
    y = jnp.maximum(y + b14_ref[...], 0.0)                       # (R, Cmid+Cout_p)

    ident = y[W:W + M, Cmid:]                                    # (M, Cout_p) f32

    # conv2's zero-padding acts on h1 (the conv1 output), not on x: zero the
    # halo rows that fall outside the image (top of block 0 / bottom of last).
    ridx = jax.lax.broadcasted_iota(jnp.int32, (R, 1), 0)
    valid = jnp.logical_and(jnp.logical_or(i > 0, ridx >= W),
                            jnp.logical_or(i < n_rb - 1, ridx < W + M))
    h1 = jnp.where(valid, y[:, :Cmid], 0.0).astype(jnp.bfloat16)  # (R, Cmid)

    # ---- stage B: 3x3 conv as 3 accumulated K=3*Cmid dots --------------------
    # Column shifts (values at x-1 / x+1) as masked sublane shifts; the row
    # shifts (ky) are aligned slices of the halo-extended slab.
    col = ridx % W
    zrow = jnp.zeros((1, Cmid), jnp.bfloat16)
    left = jnp.where(col == 0, 0.0,
                     jnp.concatenate([zrow, h1[:-1]], axis=0))    # value at x-1
    right = jnp.where(col == W - 1, 0.0,
                      jnp.concatenate([h1[1:], zrow], axis=0))    # value at x+1
    h1s = jnp.concatenate([left, h1, right], axis=1)              # (R, 3*Cmid) bf16

    h2 = jnp.dot(h1s[0:M], w2_ref[0], preferred_element_type=jnp.float32)
    h2 = h2 + jnp.dot(h1s[W:W + M], w2_ref[1], preferred_element_type=jnp.float32)
    h2 = h2 + jnp.dot(h1s[2 * W:2 * W + M], w2_ref[2], preferred_element_type=jnp.float32)
    h2 = jnp.maximum(h2 + b2_ref[...], 0.0).astype(jnp.bfloat16)  # (M, Cmid)

    # ---- stage C: conv3 (1x1, BN folded) + residual add + relu ---------------
    h3 = jnp.dot(h2, w3_ref[...], preferred_element_type=jnp.float32)
    o_ref[0, 0] = jnp.maximum(h3 + b3_ref[...] + ident, 0.0)      # (M, Cout_p)


# ---------------------------------------------------------------------------
# Wrapper: layout plumbing, tile/VMEM budgeting, pallas_call
# ---------------------------------------------------------------------------
def _round_up(x, m):
    return ((x + m - 1) // m) * m


def _vmem_bytes_per_row(W, cin, cmid, cout_pad):
    """Rough per-output-row VMEM footprint (double-buffered I/O + intermediates)."""
    return W * (
        2 * (2 * cin)             # bf16 input block, double-buffered
        + 2 * (4 * cout_pad)      # f32 output block, double-buffered
        + 4 * (cmid + cout_pad)   # stage-A activations y (f32)
        + 2 * (4 * cmid)          # h1 / left / right / lane-concat (bf16)
        + 6 * cmid                # h2 (f32 + bf16 copy)
    )


def _pick_tile_h(H, per_row_bytes, budget_bytes):
    """Largest TH dividing H whose per-step footprint fits the VMEM budget."""
    best = 1
    for th in range(1, H + 1):
        if H % th == 0 and (th + 2) * per_row_bytes <= budget_bytes:
            best = th
    return best


def basic_block1_pallas(x_nchw, kp, cout, *, tile_h=None,
                        vmem_budget_bytes=40 * 2**20):
    cmid = kp["w2"].shape[2]
    cout_pad = kp["w3"].shape[1]

    x = jnp.transpose(x_nchw, (0, 2, 3, 1)).astype(jnp.bfloat16)  # NCHW -> NHWC
    N, H, W, Cin = x.shape

    per_row = _vmem_bytes_per_row(W, Cin, cmid, cout_pad)
    TH = tile_h if tile_h is not None else _pick_tile_h(H, per_row, vmem_budget_bytes)
    assert H % TH == 0, (H, TH)
    n_rb = H // TH
    M = TH * W
    R = (TH + 2) * W

    # One zero row of vertical padding top+bottom, then per-row-block slabs
    # that already carry their 1-row halo (only 2 duplicated rows per block),
    # with the spatial dims flattened so every kernel load/store is a flat
    # (rows, channels) slab.
    xp = jnp.pad(x, ((0, 0), (1, 1), (0, 0), (0, 0)))
    xs = jnp.stack([xp[:, r * TH:r * TH + TH + 2] for r in range(n_rb)], axis=1)
    xs = xs.reshape(N, n_rb, R, Cin)

    weight_bytes = sum(int(np.prod(v.shape)) * v.dtype.itemsize for v in kp.values())
    vmem_limit = int(min(48 * 2**20,   # stay below v7x's 64 MiB physical VMEM
                         max(32 * 2**20,
                             (TH + 2) * per_row + 2 * weight_bytes + (4 << 20))))

    def const_spec(a):
        nd = a.ndim
        return pl.BlockSpec(a.shape, lambda n, i, _nd=nd: (0,) * _nd)

    out_p = pl.pallas_call(
        basic_block1_kernel,
        out_shape=jax.ShapeDtypeStruct((N, n_rb, M, cout_pad), jnp.float32),
        grid=(N, n_rb),
        in_specs=[
            pl.BlockSpec((1, 1, R, Cin), lambda n, i: (n, i, 0, 0)),
            const_spec(kp["w14"]), const_spec(kp["b14"]),
            const_spec(kp["w2"]), const_spec(kp["b2"]),
            const_spec(kp["w3"]), const_spec(kp["b3"]),
        ],
        out_specs=pl.BlockSpec((1, 1, M, cout_pad), lambda n, i: (n, i, 0, 0)),
        compiler_params=pltpu.CompilerParams(
            dimension_semantics=("parallel", "parallel"),
            vmem_limit_bytes=vmem_limit,
        ),
    )(xs, kp["w14"], kp["b14"], kp["w2"], kp["b2"], kp["w3"], kp["b3"])

    out = out_p.reshape(N, H, W, cout_pad)[..., :cout]   # drop padded channels
    return jnp.transpose(out, (0, 3, 1, 2))              # NHWC -> NCHW


# ---------------------------------------------------------------------------
# Deterministic parameter construction (PyTorch-default-style uniform init)
# ---------------------------------------------------------------------------
def init_raw_params(key, inplanes, outplanes, cmid=64):
    ks = iter(jax.random.split(key, 32))

    def conv_w(co, ci, kh, kw):
        bound = 1.0 / math.sqrt(ci * kh * kw)
        return jax.random.uniform(next(ks), (co, ci, kh, kw), jnp.float32, -bound, bound)

    def conv_b(co, ci, kh, kw):
        bound = 1.0 / math.sqrt(ci * kh * kw)
        return jax.random.uniform(next(ks), (co,), jnp.float32, -bound, bound)

    def bn(c):
        gamma = jax.random.uniform(next(ks), (c,), jnp.float32, 0.5, 1.5)
        beta = jax.random.uniform(next(ks), (c,), jnp.float32, -0.5, 0.5)
        mean = jax.random.uniform(next(ks), (c,), jnp.float32, -0.2, 0.2)
        var = jax.random.uniform(next(ks), (c,), jnp.float32, 0.5, 1.5)
        return gamma, beta, mean, var

    p = {}
    p["conv1_w"], p["conv1_b"] = conv_w(cmid, inplanes, 1, 1), conv_b(cmid, inplanes, 1, 1)
    p["conv2_w"], p["conv2_b"] = conv_w(cmid, cmid, 3, 3), conv_b(cmid, cmid, 3, 3)
    p["conv3_w"], p["conv3_b"] = conv_w(outplanes, cmid, 1, 1), conv_b(outplanes, cmid, 1, 1)
    p["conv4_w"], p["conv4_b"] = conv_w(outplanes, inplanes, 1, 1), conv_b(outplanes, inplanes, 1, 1)
    p["bn1"], p["bn2"], p["bn3"], p["bn4"] = bn(cmid), bn(cmid), bn(outplanes), bn(outplanes)
    return p


def fuse_params_for_kernel(p):
    """Fold conv bias + BN (eval mode) into per-channel scale/bias, fold the
    scale into the weight columns, pad output channels only as far as needed,
    cast matmul weights to bf16 (biases stay f32), and split conv2 into three
    per-ky K=3*Cmid matmul blocks."""
    def scale_bias(conv_b, bn_params):
        gamma, beta, mean, var = bn_params
        s = gamma / jnp.sqrt(var + EPS)
        b = beta + s * (conv_b - mean)
        return s, b

    cmid = p["conv1_w"].shape[0]
    cin = p["conv1_w"].shape[1]
    cout = p["conv3_w"].shape[0]
    assert cout <= 128, "output-channel tiling not implemented for cout > 128"
    cout_pad = 128 if cout > 64 else _round_up(cout, 8)

    s1, b1 = scale_bias(p["conv1_b"], p["bn1"])
    s2, b2 = scale_bias(p["conv2_b"], p["bn2"])
    s3, b3 = scale_bias(p["conv3_b"], p["bn3"])
    s4, b4 = scale_bias(p["conv4_b"], p["bn4"])

    # 1x1 convs as matmuls, BN scale folded into the output columns.
    w1 = jnp.transpose(p["conv1_w"].reshape(cmid, cin)) * s1[None, :]   # (Cin, 64)
    w4 = jnp.transpose(p["conv4_w"].reshape(cout, cin)) * s4[None, :]   # (Cin, cout)
    w3 = jnp.transpose(p["conv3_w"].reshape(cout, cmid)) * s3[None, :]  # (64, cout)

    w4p = jnp.zeros((cin, cout_pad), jnp.float32).at[:, :cout].set(w4)
    b4p = jnp.zeros((cout_pad,), jnp.float32).at[:cout].set(b4)
    w3p = jnp.zeros((cmid, cout_pad), jnp.float32).at[:, :cout].set(w3)
    b3p = jnp.zeros((cout_pad,), jnp.float32).at[:cout].set(b3)

    # conv2: (O,I,kh,kw) -> (kh,kw,I,O) -> (9*I, O), rows ordered (ky, kx, cin),
    # then split into 3 per-ky blocks of shape (3*I, O) = (192, 64).
    w2 = jnp.transpose(p["conv2_w"], (2, 3, 1, 0)).reshape(9 * cmid, cmid)
    w2 = (w2 * s2[None, :]).reshape(3, 3 * cmid, cmid)

    kp = {
        "w14": jnp.concatenate([w1, w4p], axis=1).astype(jnp.bfloat16),  # (Cin, 64+cout_pad)
        "b14": jnp.concatenate([b1, b4p], axis=0)[None, :],              # (1, 64+cout_pad) f32
        "w2": w2.astype(jnp.bfloat16),                                   # (3, 192, 64)
        "b2": b2[None, :],                                               # (1, 64) f32
        "w3": w3p.astype(jnp.bfloat16),                                  # (64, cout_pad)
        "b3": b3p[None, :],                                              # (1, cout_pad) f32
    }
    return kp, cout


# ---------------------------------------------------------------------------
# Pure-JAX f32 reference (lax.conv) for correctness check
# ---------------------------------------------------------------------------
def reference_forward(x, p):
    def conv(x, w, b, pad):
        y = jax.lax.conv_general_dilated(
            x, w, (1, 1), [(pad, pad), (pad, pad)],
            dimension_numbers=("NCHW", "OIHW", "NCHW"),
        )
        return y + b[None, :, None, None]

    def bn(x, bn_params):
        gamma, beta, mean, var = bn_params
        return (x - mean[None, :, None, None]) / jnp.sqrt(var[None, :, None, None] + EPS) \
            * gamma[None, :, None, None] + beta[None, :, None, None]

    relu = lambda t: jnp.maximum(t, 0.0)

    ident = relu(bn(conv(x, p["conv4_w"], p["conv4_b"], 0), p["bn4"]))
    out = relu(bn(conv(x, p["conv1_w"], p["conv1_b"], 0), p["bn1"]))
    out = relu(bn(conv(out, p["conv2_w"], p["conv2_b"], 1), p["bn2"]))
    out = bn(conv(out, p["conv3_w"], p["conv3_b"], 0), p["bn3"])
    return relu(out + ident)


if __name__ == "__main__":
    key = jax.random.PRNGKey(0)
    k_x, k_p = jax.random.split(key)

    N, inplanes, H, W = 2, 4, 16, 16
    outplanes = 8

    x = jax.random.normal(k_x, (N, inplanes, H, W), jnp.float32)

    raw = init_raw_params(k_p, inplanes, outplanes)
    kparams, cout = fuse_params_for_kernel(raw)

    ref = jax.block_until_ready(reference_forward(x, raw))

    # Run once with the auto (VMEM-budgeted) tile and once with an explicit
    # 8-row tile so the interior-halo path (grid = 2x2) is also exercised.
    for th in (None, 8):
        out = jax.block_until_ready(basic_block1_pallas(x, kparams, cout, tile_h=th))
        assert out.shape == (N, outplanes, H, W), out.shape
        # bf16 matmuls with f32 accumulation vs full-f32 reference
        np.testing.assert_allclose(np.asarray(out), np.asarray(ref), rtol=3e-2, atol=3e-2)

    print("KERNEL_OK")
</pallas_src>

<mosaic_0001>
module attributes {stable_mosaic.version = 11 : i64} {
  func.func @basic_block1_kernel(%arg0: i32, %arg1: i32, %arg2: memref<1x1x288x4xbf16, #tpu.memory_space<vmem>>, %arg3: memref<4x72xbf16, #tpu.memory_space<vmem>>, %arg4: memref<1x72xf32, #tpu.memory_space<vmem>>, %arg5: memref<3x192x64xbf16, #tpu.memory_space<vmem>>, %arg6: memref<1x64xf32, #tpu.memory_space<vmem>>, %arg7: memref<64x8xbf16, #tpu.memory_space<vmem>>, %arg8: memref<1x8xf32, #tpu.memory_space<vmem>>, %arg9: memref<1x1x256x8xf32, #tpu.memory_space<vmem>>) attributes {dimension_semantics = [#tpu.dimension_semantics<parallel>, #tpu.dimension_semantics<parallel>], iteration_bounds = array<i64: 2, 1>, scalar_prefetch = 0 : i64, scratch_operands = 0 : i64, tpu.core_type = #tpu.core_type<tc>, window_params = [{transform_indices = @transform_0, window_bounds = array<i64: 1, 1, 288, 4>}, {pipeline_mode = #tpu.pipeline_mode<synchronous>, transform_indices = @transform_1, window_bounds = array<i64: 4, 72>}, {pipeline_mode = #tpu.pipeline_mode<synchronous>, transform_indices = @transform_2, window_bounds = array<i64: 1, 72>}, {pipeline_mode = #tpu.pipeline_mode<synchronous>, transform_indices = @transform_3, window_bounds = array<i64: 3, 192, 64>}, {pipeline_mode = #tpu.pipeline_mode<synchronous>, transform_indices = @transform_4, window_bounds = array<i64: 1, 64>}, {pipeline_mode = #tpu.pipeline_mode<synchronous>, transform_indices = @transform_5, window_bounds = array<i64: 64, 8>}, {pipeline_mode = #tpu.pipeline_mode<synchronous>, transform_indices = @transform_6, window_bounds = array<i64: 1, 8>}, {transform_indices = @transform_7, window_bounds = array<i64: 1, 1, 256, 8>}]} {
    %c0 = arith.constant 0 : index
    %c0_0 = arith.constant 0 : index
    %c0_1 = arith.constant 0 : index
    %c0_2 = arith.constant 0 : index
    %0 = vector.load %arg2[%c0, %c0_0, %c0_1, %c0_2] : memref<1x1x288x4xbf16, #tpu.memory_space<vmem>>, vector<1x1x288x4xbf16>
    %1 = vector.shape_cast %0 : vector<1x1x288x4xbf16> to vector<288x4xbf16>
    %c0_3 = arith.constant 0 : index
    %c0_4 = arith.constant 0 : index
    %2 = vector.load %arg3[%c0_3, %c0_4] : memref<4x72xbf16, #tpu.memory_space<vmem>>, vector<4x72xbf16>
    %cst = arith.constant dense<0.000000e+00> : vector<288x72xf32>
    %3 = tpu.matmul %1, %2, %cst {dimension_numbers = #tpu.dot_dimension_numbers<[1], [0], [0], [1], [0, 0, 1, 1], [], []>} : vector<288x4xbf16>, vector<4x72xbf16>, vector<288x72xf32> -> vector<288x72xf32>
    %c0_5 = arith.constant 0 : index
    %c0_6 = arith.constant 0 : index
    %4 = vector.load %arg4[%c0_5, %c0_6] : memref<1x72xf32, #tpu.memory_space<vmem>>, vector<1x72xf32>
    %5 = vector.broadcast %4 : vector<1x72xf32> to vector<288x72xf32>
    %6 = arith.addf %3, %5 : vector<288x72xf32>
    %cst_7 = arith.constant 0.000000e+00 : f32
    %7 = vector.broadcast %cst_7 : f32 to vector<288x72xf32>
    %8 = arith.maximumf %6, %7 : vector<288x72xf32>
    %9 = vector.extract_strided_slice %8 {offsets = [16, 64], sizes = [256, 8], strides = [1, 1]} : vector<288x72xf32> to vector<256x8xf32>
    %10 = tpu.iota {dimensions = array<i32: 0>} : vector<288x1xi32>
    %c0_i32 = arith.constant 0 : i32
    %11 = arith.cmpi sgt, %arg1, %c0_i32 : i32
    %c16_i32 = arith.constant 16 : i32
    %12 = vector.broadcast %c16_i32 : i32 to vector<288x1xi32>
    %13 = arith.cmpi sge, %10, %12 : vector<288x1xi32>
    %14 = vector.broadcast %11 : i1 to vector<288x1xi1>
    %15 = arith.ori %14, %13 : vector<288x1xi1>
    %c0_i32_8 = arith.constant 0 : i32
    %16 = arith.cmpi slt, %arg1, %c0_i32_8 : i32
    %c272_i32 = arith.constant 272 : i32
    %17 = vector.broadcast %c272_i32 : i32 to vector<288x1xi32>
    %18 = arith.cmpi slt, %10, %17 : vector<288x1xi32>
    %19 = vector.broadcast %16 : i1 to vector<288x1xi1>
    %20 = arith.ori %19, %18 : vector<288x1xi1>
    %21 = arith.andi %15, %20 : vector<288x1xi1>
    %22 = vector.extract_strided_slice %8 {offsets = [0, 0], sizes = [288, 64], strides = [1, 1]} : vector<288x72xf32> to vector<288x64xf32>
    %cst_9 = arith.constant 0.000000e+00 : f32
    %23 = vector.shape_cast %21 : vector<288x1xi1> to vector<288x1xi1>
    %24 = vector.broadcast %23 : vector<288x1xi1> to vector<288x64xi1>
    %25 = vector.broadcast %cst_9 : f32 to vector<288x64xf32>
    %26 = arith.select %24, %22, %25 : vector<288x64xi1>, vector<288x64xf32>
    %27 = arith.truncf %26 : vector<288x64xf32> to vector<288x64xbf16>
    %c16_i32_10 = arith.constant 16 : i32
    %c0_i32_11 = arith.constant 0 : i32
    %28 = arith.cmpi eq, %c16_i32_10, %c0_i32_11 : i32
    %c1_i32 = arith.constant 1 : i32
    %29 = arith.select %28, %c1_i32, %c16_i32_10 : i32
    %30 = vector.broadcast %29 : i32 to vector<288x1xi32>
    %31 = arith.remsi %10, %30 : vector<288x1xi32>
    %c0_i32_12 = arith.constant 0 : i32
    %32 = vector.broadcast %c0_i32_12 : i32 to vector<288x1xi32>
    %33 = arith.cmpi ne, %31, %32 : vector<288x1xi32>
    %c0_i32_13 = arith.constant 0 : i32
    %34 = vector.broadcast %c0_i32_13 : i32 to vector<288x1xi32>
    %35 = arith.cmpi slt, %31, %34 : vector<288x1xi32>
    %c0_i32_14 = arith.constant 0 : i32
    %36 = arith.cmpi slt, %29, %c0_i32_14 : i32
    %37 = vector.broadcast %36 : i1 to vector<288x1xi1>
    %38 = vector.broadcast %37 : vector<288x1xi1> to vector<288x1xi1>
    %39 = arith.xori %35, %38 : vector<288x1xi1>
    %40 = arith.andi %39, %33 : vector<288x1xi1>
    %41 = vector.broadcast %29 : i32 to vector<288x1xi32>
    %42 = arith.addi %31, %41 : vector<288x1xi32>
    %43 = arith.select %40, %42, %31 : vector<288x1xi1>, vector<288x1xi32>
    %cst_15 = arith.constant 0.000000e+00 : bf16
    %44 = vector.broadcast %cst_15 : bf16 to vector<1x64xbf16>
    %c0_i32_16 = arith.constant 0 : i32
    %45 = vector.broadcast %c0_i32_16 : i32 to vector<288x1xi32>
    %46 = arith.cmpi eq, %43, %45 : vector<288x1xi32>
    %47 = vector.extract_strided_slice %27 {offsets = [0, 0], sizes = [287, 64], strides = [1, 1]} : vector<288x64xbf16> to vector<287x64xbf16>
    %48 = tpu.concatenate %44, %47 in 0 : vector<1x64xbf16>, vector<287x64xbf16> -> vector<288x64xbf16>
    %cst_17 = arith.constant 0.000000e+00 : f32
    %49 = arith.truncf %cst_17 : f32 to bf16
    %50 = vector.shape_cast %46 : vector<288x1xi1> to vector<288x1xi1>
    %51 = vector.broadcast %50 : vector<288x1xi1> to vector<288x64xi1>
    %52 = vector.broadcast %49 : bf16 to vector<288x64xbf16>
    %53 = arith.select %51, %52, %48 : vector<288x64xi1>, vector<288x64xbf16>
    %c15_i32 = arith.constant 15 : i32
    %54 = vector.broadcast %c15_i32 : i32 to vector<288x1xi32>
    %55 = arith.cmpi eq, %43, %54 : vector<288x1xi32>
    %56 = vector.extract_strided_slice %27 {offsets = [1, 0], sizes = [287, 64], strides = [1, 1]} : vector<288x64xbf16> to vector<287x64xbf16>
    %57 = tpu.concatenate %56, %44 in 0 : vector<287x64xbf16>, vector<1x64xbf16> -> vector<288x64xbf16>
    %cst_18 = arith.constant 0.000000e+00 : f32
    %58 = arith.truncf %cst_18 : f32 to bf16
    %59 = vector.shape_cast %55 : vector<288x1xi1> to vector<288x1xi1>
    %60 = vector.broadcast %59 : vector<288x1xi1> to vector<288x64xi1>
    %61 = vector.broadcast %58 : bf16 to vector<288x64xbf16>
    %62 = arith.select %60, %61, %57 : vector<288x64xi1>, vector<288x64xbf16>
    %63 = tpu.concatenate %53, %27, %62 in 1 : vector<288x64xbf16>, vector<288x64xbf16>, vector<288x64xbf16> -> vector<288x192xbf16>
    %64 = vector.extract_strided_slice %63 {offsets = [0, 0], sizes = [256, 192], strides = [1, 1]} : vector<288x192xbf16> to vector<256x192xbf16>
    %c0_19 = arith.constant 0 : index
    %c0_20 = arith.constant 0 : index
    %c0_21 = arith.constant 0 : index
    %65 = vector.load %arg5[%c0_19, %c0_20, %c0_21] : memref<3x192x64xbf16, #tpu.memory_space<vmem>>, vector<1x192x64xbf16>
    %66 = vector.shape_cast %65 : vector<1x192x64xbf16> to vector<192x64xbf16>
    %cst_22 = arith.constant dense<0.000000e+00> : vector<256x64xf32>
    %67 = tpu.matmul %64, %66, %cst_22 {dimension_numbers = #tpu.dot_dimension_numbers<[1], [0], [0], [1], [0, 0, 1, 1], [], []>} : vector<256x192xbf16>, vector<192x64xbf16>, vector<256x64xf32> -> vector<256x64xf32>
    %68 = vector.extract_strided_slice %63 {offsets = [16, 0], sizes = [256, 192], strides = [1, 1]} : vector<288x192xbf16> to vector<256x192xbf16>
    %c1 = arith.constant 1 : index
    %c0_23 = arith.constant 0 : index
    %c0_24 = arith.constant 0 : index
    %69 = vector.load %arg5[%c1, %c0_23, %c0_24] : memref<3x192x64xbf16, #tpu.memory_space<vmem>>, vector<1x192x64xbf16>
    %70 = vector.shape_cast %69 : vector<1x192x64xbf16> to vector<192x64xbf16>
    %cst_25 = arith.constant dense<0.000000e+00> : vector<256x64xf32>
    %71 = tpu.matmul %68, %70, %cst_25 {dimension_numbers = #tpu.dot_dimension_numbers<[1], [0], [0], [1], [0, 0, 1, 1], [], []>} : vector<256x192xbf16>, vector<192x64xbf16>, vector<256x64xf32> -> vector<256x64xf32>
    %72 = arith.addf %67, %71 : vector<256x64xf32>
    %73 = vector.extract_strided_slice %63 {offsets = [32, 0], sizes = [256, 192], strides = [1, 1]} : vector<288x192xbf16> to vector<256x192xbf16>
    %c2 = arith.constant 2 : index
    %c0_26 = arith.constant 0 : index
    %c0_27 = arith.constant 0 : index
    %74 = vector.load %arg5[%c2, %c0_26, %c0_27] : memref<3x192x64xbf16, #tpu.memory_space<vmem>>, vector<1x192x64xbf16>
    %75 = vector.shape_cast %74 : vector<1x192x64xbf16> to vector<192x64xbf16>
    %cst_28 = arith.constant dense<0.000000e+00> : vector<256x64xf32>
    %76 = tpu.matmul %73, %75, %cst_28 {dimension_numbers = #tpu.dot_dimension_numbers<[1], [0], [0], [1], [0, 0, 1, 1], [], []>} : vector<256x192xbf16>, vector<192x64xbf16>, vector<256x64xf32> -> vector<256x64xf32>
    %77 = arith.addf %72, %76 : vector<256x64xf32>
    %c0_29 = arith.constant 0 : index
    %c0_30 = arith.constant 0 : index
    %78 = vector.load %arg6[%c0_29, %c0_30] : memref<1x64xf32, #tpu.memory_space<vmem>>, vector<1x64xf32>
    %79 = vector.broadcast %78 : vector<1x64xf32> to vector<256x64xf32>
    %80 = arith.addf %77, %79 : vector<256x64xf32>
    %cst_31 = arith.constant 0.000000e+00 : f32
    %81 = vector.broadcast %cst_31 : f32 to vector<256x64xf32>
    %82 = arith.maximumf %80, %81 : vector<256x64xf32>
    %83 = arith.truncf %82 : vector<256x64xf32> to vector<256x64xbf16>
    %c0_32 = arith.constant 0 : index
    %c0_33 = arith.constant 0 : index
    %84 = vector.load %arg7[%c0_32, %c0_33] : memref<64x8xbf16, #tpu.memory_space<vmem>>, vector<64x8xbf16>
    %cst_34 = arith.constant dense<0.000000e+00> : vector<256x8xf32>
    %85 = tpu.matmul %83, %84, %cst_34 {dimension_numbers = #tpu.dot_dimension_numbers<[1], [0], [0], [1], [0, 0, 1, 1], [], []>} : vector<256x64xbf16>, vector<64x8xbf16>, vector<256x8xf32> -> vector<256x8xf32>
    %c0_35 = arith.constant 0 : index
    %c0_36 = arith.constant 0 : index
    %86 = vector.load %arg8[%c0_35, %c0_36] : memref<1x8xf32, #tpu.memory_space<vmem>>, vector<1x8xf32>
    %87 = vector.broadcast %86 : vector<1x8xf32> to vector<256x8xf32>
    %88 = arith.addf %85, %87 : vector<256x8xf32>
    %89 = arith.addf %88, %9 : vector<256x8xf32>
    %cst_37 = arith.constant 0.000000e+00 : f32
    %90 = vector.broadcast %cst_37 : f32 to vector<256x8xf32>
    %91 = arith.maximumf %89, %90 : vector<256x8xf32>
    %c0_38 = arith.constant 0 : index
    %c0_39 = arith.constant 0 : index
    %c0_40 = arith.constant 0 : index
    %c0_41 = arith.constant 0 : index
    %92 = vector.load %arg9[%c0_38, %c0_39, %c0_40, %c0_41] : memref<1x1x256x8xf32, #tpu.memory_space<vmem>>, vector<1x1x256x8xf32>
    %93 = vector.shape_cast %92 : vector<1x1x256x8xf32> to vector<256x8xf32>
    %94 = vector.shape_cast %91 : vector<256x8xf32> to vector<1x1x256x8xf32>
    tpu.vector_store %arg9[%c0_38, %c0_39, %c0_40, %c0_41], %94 {strides = array<i32>} : memref<1x1x256x8xf32, #tpu.memory_space<vmem>>, vector<1x1x256x8xf32>,
    return
  }
  func.func @transform_0(%arg0: i32, %arg1: i32) -> (i32, i32, i32, i32) {
    %c0_i32 = arith.constant 0 : i32
    %c0_i32_0 = arith.constant 0 : i32
    %c0_i32_1 = arith.constant 0 : i32
    return %arg0, %arg1, %c0_i32, %c0_i32_0 : i32, i32, i32, i32
  }
  func.func @transform_1(%arg0: i32, %arg1: i32) -> (i32, i32) {
    %c0_i32 = arith.constant 0 : i32
    %c0_i32_0 = arith.constant 0 : i32
    %c0_i32_1 = arith.constant 0 : i32
    return %c0_i32, %c0_i32_0 : i32, i32
  }
  func.func @transform_2(%arg0: i32, %arg1: i32) -> (i32, i32) {
    %c0_i32 = arith.constant 0 : i32
    %c0_i32_0 = arith.constant 0 : i32
    %c0_i32_1 = arith.constant 0 : i32
    return %c0_i32, %c0_i32_0 : i32, i32
  }
  func.func @transform_3(%arg0: i32, %arg1: i32) -> (i32, i32, i32) {
    %c0_i32 = arith.constant 0 : i32
    %c0_i32_0 = arith.constant 0 : i32
    %c0_i32_1 = arith.constant 0 : i32
    %c0_i32_2 = arith.constant 0 : i32
    return %c0_i32, %c0_i32_0, %c0_i32_1 : i32, i32, i32
  }
  func.func @transform_4(%arg0: i32, %arg1: i32) -> (i32, i32) {
    %c0_i32 = arith.constant 0 : i32
    %c0_i32_0 = arith.constant 0 : i32
    %c0_i32_1 = arith.constant 0 : i32
    return %c0_i32, %c0_i32_0 : i32, i32
  }
  func.func @transform_5(%arg0: i32, %arg1: i32) -> (i32, i32) {
    %c0_i32 = arith.constant 0 : i32
    %c0_i32_0 = arith.constant 0 : i32
    %c0_i32_1 = arith.constant 0 : i32
    return %c0_i32, %c0_i32_0 : i32, i32
  }
  func.func @transform_6(%arg0: i32, %arg1: i32) -> (i32, i32) {
    %c0_i32 = arith.constant 0 : i32
    %c0_i32_0 = arith.constant 0 : i32
    %c0_i32_1 = arith.constant 0 : i32
    return %c0_i32, %c0_i32_0 : i32, i32
  }
  func.func @transform_7(%arg0: i32, %arg1: i32) -> (i32, i32, i32, i32) {
    %c0_i32 = arith.constant 0 : i32
    %c0_i32_0 = arith.constant 0 : i32
    %c0_i32_1 = arith.constant 0 : i32
    return %arg0, %arg1, %c0_i32, %c0_i32_0 : i32, i32, i32, i32
  }
}

</mosaic_0001>

<bundles_post_ra>
// kernel: tpu_custom_call.1
= control target key start
LH: loop header
LB: loop body
LE: loop exit
PB: predicated region body
PF: predicated region fallthrough
CT: control target
= control target key end

     0   :  { %s4460_s24 = smov 0   ;;  %s4462_s25 = smov 0   ;;  %s6124_s0 = inlined_call_operand.vmem [shape: bf16[2,1,288,4], index: 0, kind: input, shape index: {}]   ;;  %s6125_s1 = inlined_call_operand.vmem [shape: bf16[4,72], index: 1, kind: input, shape index: {}]   ;;  %s6126_s2 = inlined_call_operand.vmem [shape: f32[1,72], index: 2, kind: input, shape index: {}]   ;;  %s6127_s3 = inlined_call_operand.vmem [shape: bf16[3,192,64], index: 3, kind: input, shape index: {}]   ;;  %s6128_s4 = inlined_call_operand.vmem [shape: f32[1,64], index: 4, kind: input, shape index: {}]   ;;  %s6129_s5 = inlined_call_operand.vmem [shape: bf16[64,8], index: 5, kind: input, shape index: {}]   ;;  %s6130_s6 = inlined_call_operand.vmem [shape: f32[1,8], index: 6, kind: input, shape index: {}]   ;;  %s6131_s7 = inlined_call_operand.vmem [shape: f32[2,1,256,8], index: 7, kind: output, shape index: {}]  }
   0x1   :  { %s4464_s26 = smov 0  }
   0x2 LB: > { %s29_s27 = sadd.s32 1, %s4410_s25  ;;  %p3929_p0 = scmp.ge.s32.totalorder %s4414_s26, 1  ;;  %s4414_s26 = sphi %s4464_s26, %s17_s26   ;;  %s4410_s25 = sphi %s4462_s25, %s6312_s25   ;;  %s4406_s24 = sphi %s4460_s24, %s6311_s24  }
   0x3   : > { %p31_p1 = scmp.ge.s32.totalorder %s29_s27, 2  ;;  %p257_p2 = scmp.lt.s32.totalorder %s4414_s26, 3 }
   0x5   : > { %s6314_s27 = smov (%p31_p1, %s29_s27), 0  ;;  %p258_p3 = pnand %p3929_p0, %p257_p2 }
   0x7   : > { %261 = sbr.rel (%p258_p3) target bundleno = 985 (0x3d9), region = 48 }
   0xc   : > { %v354_v0 = vld [vmem:[%s6125_s1] sm:$0x3]  ;;  %vm507_vm0 = vcmask 1041408   ;;  %p297_p4 = scmp.lt.s32.totalorder %s4406_s24, 1  ;;  %vm452_vm1 = vcmask 31744   ;;  %v6148_v20 = vmov 0   ;;  %v724_v33 = vlaneseq }
   0xd   : > { %4304 = vmatprep.subr.msk.bf16.mxu0 %vm507_vm0, %v354_v0  ;;  %v509_v1 = vsel %vm507_vm0, %v354_v0, 0  ;;  %2583 = vmatprep.subr.bf16.mxu1 %v6148_v20  ;;  %v4352_v21 = vld [vmem:[%s6127_s3 + $0x98] sm:$0xff]   ;;  %v4353_v22 = vld [vmem:[%s6127_s3 + $0x90] sm:$0xff]   ;;  %v4354_v23 = vld [vmem:[%s6127_s3 + $0x88] sm:$0xff]   ;;  %vm4417_vm3 = vmmov 0   ;;  %s4418_s19 = smov 64  }
   0xe   : > { %4203 = vmatpush3.bf16.msra.mxu0 %v509_v1  ;;  %s6316_s24 = smov (!%p297_p4, %s4406_s24), 1  ;;  %2584 = vmatpush1.bf16.msra.mxu1 %v4352_v21  ;;  %v4355_v24 = vld [vmem:[%s6127_s3 + $0x80] sm:$0xff]   ;;  %v4356_v25 = vld [vmem:[%s6127_s3 + $0x78] sm:$0xff]   ;;  %v4358_v27 = vld [vmem:[%s6127_s3 + $0x70] sm:$0xff]   ;;  %v4581_v36 = vshrl.u32 %v724_v33, 7  ;;  %vm2341_vm10 = vcmask 523264  }
   0xf   : > { %s4305_s30 = smul.u32 144, %s6316_s24  ;;  %2819 = vmatprep.subr.bf16.mxu0 %v6148_v20  ;;  %2585 = vmatprep.subr.bf16.mxu1 %v6148_v20  ;;  %v4357_v26 = vld [vmem:[%s6127_s3 + $0x38] sm:$0xff]   ;;  %v4359_v28 = vld [vmem:[%s6127_s3 + $0x30] sm:$0xff]   ;;  %v4360_v29 = vld [vmem:[%s6127_s3 + $0x68] sm:$0xff]   ;;  %vm1978_vm7 = vsmask.f32 7424 }
  0x10   : > { %v4361_v30 = vld [vmem:[%s6127_s3 + $0x60] sm:$0xff]   ;;  %v4362_v31 = vld [vmem:[%s6127_s3 + $0x28] sm:$0xff]   ;;  %v4363_v32 = vld [vmem:[%s6127_s3 + $0xb8] sm:$0xff]   ;;  %v726_v39 = vadd.s32 8, %v4581_v36  ;;  %v728_v49 = vadd.s32 24, %v4581_v36  ;;  %s4162_s22 = sshll.u32 %s6316_s24, 8 }
  0x11   : > { %s4487_s10 = scalar_lea.vmem %s6124_s0, %s4305_s30  ;;  %v4364_v34 = vld [vmem:[%s6127_s3 + $0x20] sm:$0xff]   ;;  %v4365_v35 = vld [vmem:[%s6127_s3 + $0xb0] sm:$0xff]   ;;  %v4366_v37 = vld [vmem:[%s6127_s3 + $0x18] sm:$0xff]   ;;  %vm1543_vm11 = vsmask.f32 256  ;;  %s6019_s29 = scalar_lea.vmem %s6131_s7, %s4162_s22 }
  0x12   : > { %v4334_v2 = vld [vmem:[%s4487_s10] sm:$0xff]   ;;  %v4335_v3 = vld [vmem:[%s4487_s10 + $0x8] sm:$0xff]   ;;  %v4336_v4 = vld [vmem:[%s4487_s10 + $0x10] sm:$0xff]   ;;  %2586 = vmatpush1.bf16.msra.mxu1 %v4353_v22  ;;  %v1086_v42 = vand.u32 15, %v726_v39  ;;  %v1100_v57 = vand.u32 15, %v728_v49 }
  0x13   : > { %4204 = vmatprep.mubr.msk.bf16.mxu0 %vm452_vm1, %v4334_v2  ;;  %v4337_v5 = vld [vmem:[%s4487_s10 + $0x18] sm:$0xff]   ;;  %v4338_v6 = vld [vmem:[%s4487_s10 + $0x20] sm:$0xff]   ;;  %v4339_v7 = vld [vmem:[%s4487_s10 + $0x28] sm:$0xff]   ;;  %2587 = vmatprep.subr.bf16.mxu1 %v6148_v20 }
  0x14   : > { %4205 = vmatmul.mubr.msk.bf16.vlgmr.msra.gmra.mxu0 %vm452_vm1, %v4335_v3  ;;  %v4340_v8 = vld [vmem:[%s4487_s10 + $0x30] sm:$0xff]   ;;  %v4341_v9 = vld [vmem:[%s4487_s10 + $0x38] sm:$0xff]   ;;  %v4342_v10 = vld [vmem:[%s4487_s10 + $0x40] sm:$0xff]   ;;  %vm4610_vm2 = vcmp.eq.s32.totalorder %v1086_v42, 15  ;;  %vm4646_vm6 = vcmp.eq.s32.totalorder %v1100_v57, 15 }
  0x15   : > { %4208 = vmatprep.mubr.msk.bf16.mxu0 %vm452_vm1, %v4336_v4  ;;  %v4343_v11 = vld [vmem:[%s4487_s10 + $0x48] sm:$0xff]   ;;  %v4344_v12 = vld [vmem:[%s4487_s10 + $0x50] sm:$0xff]   ;;  %v4345_v13 = vld [vmem:[%s4487_s10 + $0x58] sm:$0xff]   ;;  %2820 = vmatpush1.bf16.msra.mxu0 %v4357_v26 }
  0x16   : > { %v4346_v14 = vld [vmem:[%s4487_s10 + $0x60] sm:$0xff]   ;;  %v4347_v15 = vld [vmem:[%s4487_s10 + $0x68] sm:$0xff]   ;;  %v4348_v16 = vld [vmem:[%s4487_s10 + $0x70] sm:$0xff]   ;;  %2588 = vmatpush1.bf16.msra.mxu1 %v4354_v23  ;;  %2821 = vmatprep.subr.bf16.mxu0 %v6148_v20 }
  0x17   : > { %v4349_v17 = vld [vmem:[%s4487_s10 + $0x78] sm:$0xff]   ;;  %v4350_v18 = vld [vmem:[%s4487_s10 + $0x80] sm:$0xff]   ;;  %v4351_v19 = vld [vmem:[%s4487_s10 + $0x88] sm:$0xff]   ;;  %2589 = vmatprep.subr.bf16.mxu1 %v6148_v20 }
  0x18   : > { %v4367_v38 = vld [vmem:[%s6127_s3 + $0xa8] sm:$0xff]   ;;  %v4368_v40 = vld [vmem:[%s6127_s3 + $0x10] sm:$0xff]   ;;  %v4369_v41 = vld [vmem:[%s6127_s3 + $0xa0] sm:$0xff]  }
  0x19   : > { %2822 = vmatpush1.bf16.msra.mxu0 %v4359_v28  ;;  %v4370_v43 = vld [vmem:[%s6127_s3 + $0x8] sm:$0xff]   ;;  %v4608_v45 = vld [vmem:[%s6126_s2] ss:$0 sm:$0xff]  ;;  %vm1781_vm4 = vmpackc.low %vm4417_vm3, %vm4417_vm3 }
  0x1a   : > { %2590 = vmatpush1.bf16.msra.mxu1 %v4355_v24  ;;  %2823 = vmatprep.subr.bf16.mxu0 %v6148_v20  ;;  %v4372_v47 = vld [vmem:[%s6127_s3] sm:$0xff]   ;;  %vm2126_vm5 = vmpackc.low %vm4610_vm2, %vm4610_vm2  ;;  %v4373_v53 = vld [vmem:[%s6127_s3 + $0x58] sm:$0xff]   ;;  %v4633_v55 = vsel %vm1781_vm4, 65537, %v6148_v20 }
  0x1b   : > { %2591 = vmatprep.subr.bf16.mxu1 %v6148_v20  ;;  %v2162_v56 = vsel %vm2126_vm5, 65537, %v6148_v20  ;;  %v4374_v1 = vld [vmem:[%s6127_s3 + $0x50] sm:$0xff]   ;;  %vm2128_vm9 = vmpackc.low %vm4646_vm6, %vm4646_vm6 }
  0x1c   : > { %4209 = vmatmul.mubr.msk.bf16.gmra.mxu0 %vm452_vm1, %v4337_v5  ;;  %v3988_v62 = vcombine.low %v4633_v55, %v2162_v56  ;;  %v4661_v5 = vrot.slane %v6148_v20, 1  ;;  %v2164_v21 = vsel %vm2128_vm9, 65537, %v6148_v20 }
  0x1d   : > { %4212 = vmatprep.mubr.msk.bf16.mxu0 %vm452_vm1, %v4338_v6  ;;  %2824 = vmatpush1.bf16.msra.mxu0 %v4362_v31 }
  0x1e   : > { %2592 = vmatpush1.bf16.msra.mxu1 %v4356_v25  ;;  %2825 = vmatprep.subr.bf16.mxu0 %v6148_v20  ;;  %6167 = vst [vmem:[#allocation2_spill] sm:$0xff] %v4661_v5  ;;  %vm4668_vm8 = vcmp.ne.s16.totalorder %v3988_v62, 0 }
  0x1f   : > { %2593 = vmatprep.subr.bf16.mxu1 %v6148_v20 }
  0x21   : > { %2826 = vmatpush1.bf16.msra.mxu0 %v4364_v34 }
  0x22   : > { %2594 = vmatpush1.bf16.msra.mxu1 %v4358_v27  ;;  %2827 = vmatprep.subr.bf16.mxu0 %v6148_v20 }
  0x23   : > { %2595 = vmatprep.subr.bf16.mxu1 %v6148_v20 }
  0x24   : > { %4213 = vmatmul.mubr.msk.bf16.gmra.mxu0 %vm452_vm1, %v4339_v7 }
  0x25   : > { %4216 = vmatprep.mubr.msk.bf16.mxu0 %vm452_vm1, %v4340_v8  ;;  %2828 = vmatpush1.bf16.msra.mxu0 %v4366_v37 }
  0x26   : > { %2596 = vmatpush1.bf16.msra.mxu1 %v4360_v29  ;;  %2829 = vmatprep.subr.bf16.mxu0 %v6148_v20  ;;  %v3989_v29 = vcombine.low %v4633_v55, %v2164_v21 }
  0x27   : > { %2597 = vmatprep.subr.bf16.mxu1 %v6148_v20 }
  0x28   : > { %vm4735_vm12 = vcmp.ne.s16.totalorder %v3989_v29, 0 }
  0x29   : > { %2830 = vmatpush1.bf16.msra.mxu0 %v4368_v40 }
  0x2a   : > { %2598 = vmatpush1.bf16.msra.mxu1 %v4361_v30  ;;  %2831 = vmatprep.subr.bf16.mxu0 %v6148_v20  ;;  %v4377_v30 = vld [vmem:[%s6127_s3 + $0x40] sm:$0xff]  }
  0x2b   : > { %2607 = vmatprep.subr.bf16.mxu1 %v6148_v20 }
  0x2c   : > { %4217 = vmatmul.mubr.msk.bf16.gmra.mxu0 %vm452_vm1, %v4341_v9 }
  0x2d   : > { %4220 = vmatprep.mubr.msk.bf16.mxu0 %vm452_vm1, %v4342_v10  ;;  %2832 = vmatpush1.bf16.msra.mxu0 %v4370_v43 }
  0x2e   : > { %2608 = vmatpush2.bf16.msra.mxu1 %v4363_v32  ;;  %2833 = vmatprep.subr.bf16.mxu0 %v6148_v20 }
  0x2f   : > { %2609 = vmatprep.subr.bf16.mxu1 %v6148_v20 }
  0x31   : > { %2834 = vmatpush1.bf16.msra.mxu0 %v4372_v47 }
  0x32   : > { %2610 = vmatpush2.bf16.msra.mxu1 %v4365_v35  ;;  %2843 = vmatprep.subr.bf16.mxu0 %v6148_v20 }
  0x33   : > { %2611 = vmatprep.subr.bf16.mxu1 %v6148_v20 }
  0x34   : > { %4221 = vmatmul.mubr.msk.bf16.gmra.mxu0 %vm452_vm1, %v4343_v11  ;;  %v4376_v11 = vld [vmem:[%s6127_s3 + $0x48] sm:$0xff]  }
  0x35   : > { %4224 = vmatprep.mubr.msk.bf16.mxu0 %vm452_vm1, %v4344_v12  ;;  %2844 = vmatpush2.bf16.msra.mxu0 %v4373_v53 }
  0x36   : > { %2612 = vmatpush2.bf16.msra.mxu1 %v4367_v38  ;;  %2845 = vmatprep.subr.bf16.mxu0 %v6148_v20 }
  0x37   : > { %2613 = vmatprep.subr.bf16.mxu1 %v6148_v20 }
  0x39   : > { %2846 = vmatpush2.bf16.msra.mxu0 %v4374_v1 }
  0x3a   : > { %2614 = vmatpush2.bf16.msra.mxu1 %v4369_v41  ;;  %2847 = vmatprep.subr.bf16.mxu0 %v6148_v20 }
  0x3b   : > { %4280 = vmatprep.subr.bf16.mxu1 %v6148_v20 }
  0x3c   : > { %4225 = vmatmul.mubr.msk.bf16.gmra.mxu0 %vm452_vm1, %v4345_v13 }
  0x3d   : > { %4228 = vmatprep.mubr.msk.bf16.mxu0 %vm452_vm1, %v4346_v14  ;;  %2848 = vmatpush2.bf16.msra.mxu0 %v4376_v11 }
  0x3e   : > { %2849 = vmatprep.subr.bf16.mxu0 %v6148_v20 }
  0x41   : > { %2850 = vmatpush2.bf16.msra.mxu0 %v4377_v30 }
  0x42   : > { %3080 = vmatprep.subr.bf16.mxu0 %v6148_v20 }
  0x44   : > { %4229 = vmatmul.mubr.msk.bf16.gmra.mxu0 %vm452_vm1, %v4347_v15 }
  0x45   : > { %4232 = vmatprep.mubr.msk.bf16.mxu0 %vm452_vm1, %v4348_v16 }
  0x4c   : > { %4233 = vmatmul.mubr.msk.bf16.gmra.mxu0 %vm452_vm1, %v4349_v17 }
  0x4d   : > { %4236 = vmatprep.mubr.msk.bf16.mxu0 %vm452_vm1, %v4350_v18 }
  0x54   : > { %4237 = vmatmul.mubr.msk.bf16.gmra.mxu0 %vm452_vm1, %v4351_v19 }
  0xd4   : > { %v4206_v44 = vpop.f32.mrf.mxu0 }
  0xd5   : > { %v4620_v50 = vadd.f32 %v4206_v44, %v4608_v45 }
  0xd6   : > { %v545_v48 = vpop.f32.mrf.mxu0 }
  0xd7   : > { %v6147_v58 = vmax.f32 %v4620_v50, 0.0 }
  0xd8   : > { %v4207_v51 = vpop.f32.mrf.mxu0 }
  0xd9   : > { %v4627_v52 = vadd.f32 %v4207_v51, %v4608_v45 }
  0xda   : > { %v548_v54 = vpop.f32.mrf.mxu0 }
  0xdb   : > { %v6151_v59 = vmax.f32 %v4627_v52, 0.0 }
  0xdc   : > { %v4210_v60 = vpop.f32.mrf.mxu0 }
  0xdd   : > { %v4643_v61 = vpack.c.bf16 %v6151_v59, %v6147_v58  ;;  %v4656_v4 = vadd.f32 %v4210_v60, %v4608_v45 }
  0xde   : > { %v561_v63 = vpop.f32.mrf.mxu0 }
  0xdf   : > { %v1552_v2 = vshrl.u32 %v4643_v61, 16  ;;  %v1555_v3 = vshll.u32 %v4643_v61, 16  ;;  %2307 = vrot.lane.b32.xlu0 %v4643_v61, %s4418_s19  ;;  %v4680_v12 = vadd.f32 %v4608_v45, %v561_v63  ;;  %v6143_v14 = vmax.f32 %v4656_v4, 0.0 }
  0xe0   : > { %v4211_v6 = vpop.f32.mrf.mxu0 }
  0xe1   : > { %v4663_v7 = vrot.slane %v1552_v2, 7  ;;  %v4666_v8 = vadd.f32 %v4211_v6, %v4608_v45  ;;  %v1981_v9 = vrot.slane %v1555_v3, 1  ;;  %v6145_v26 = vmax.f32 %v4680_v12, 0.0 }
  0xe2   : > { %v564_v13 = vpop.f32.mrf.mxu0 }
  0xe3   : > { %v6146_v15 = vmax.f32 %v4666_v8, 0.0  ;;  %v4685_v16 = vadd.f32 %v4608_v45, %v564_v13  ;;  %v1982_v17 = vsel %vm1978_vm7, %v4661_v5, %v1981_v9  ;;  %v4693_v22 = vor.u32 %v1555_v3, %v4663_v7 }
  0xe4   : > { %v4214_v18 = vpop.f32.mrf.mxu0  ;;  %v2269_v19 = vsel %vm4668_vm8, 0, %v1982_v17  ;;  %v1983_v51 = vor.u32 %v1981_v9, %v1552_v2 }
  0xe5   : > { %v4699_v23 = vpack.c.bf16 %v6146_v15, %v6143_v14  ;;  %v6150_v24 = vmax.f32 %v4685_v16, 0.0  ;;  %v4703_v25 = vadd.f32 %v4214_v18, %v4608_v45  ;;  %4070 = vmatprep.mubr.msk.bf16.mxu0 %vm2341_vm10, %v2269_v19 }
  0xe6   : > { %v577_v27 = vpop.f32.mrf.mxu0 }
  0xe7   : > { %v1568_v28 = vshrl.u32 %v4699_v23, 16  ;;  %2311 = vrot.lane.b32.xlu1 %v4699_v23, %s4418_s19  ;;  %v4716_v31 = vadd.f32 %v4608_v45, %v577_v27  ;;  %v1059_v33 = vpack.c.bf16 %v6150_v24, %v6145_v26  ;;  %v1571_v35 = vshll.u32 %v4699_v23, 16 }
  0xe8   : > { %v4215_v32 = vpop.f32.mrf.mxu0  ;;  %v6135_v37 = vmax.f32 %v4703_v25, 0.0 }
  0xe9   : > { %v4722_v34 = vrot.slane %v1568_v28, 7  ;;  %v4727_v38 = vadd.f32 %v4215_v32, %v4608_v45  ;;  %2309 = vrot.lane.b32.xlu0 %v1059_v33, %s4418_s19  ;;  %v1560_v39 = vshrl.u32 %v1059_v33, 16  ;;  %v1563_v41 = vshll.u32 %v1059_v33, 16 }
  0xea   : > { %v580_v40 = vpop.f32.mrf.mxu0  ;;  %v6137_v47 = vmax.f32 %v4716_v31, 0.0  ;;  %v1987_v60 = vrot.slane %v1571_v35, 1 }
  0xeb   : > { %v6138_v42 = vmax.f32 %v4727_v38, 0.0  ;;  %v4733_v43 = vadd.f32 %v4608_v45, %v580_v40  ;;  %v1573_v46 = vor.u32 %v1571_v35, %v4722_v34  ;;  %v1562_v48 = vrot.slane %v1560_v39, 7 }
  0xec   : > { %v4218_v49 = vpop.f32.mrf.mxu0  ;;  %v1984_v53 = vrot.slane %v1563_v41, 1  ;;  %v1989_v40 = vor.u32 %v1987_v60, %v1568_v28 }
  0xed   : > { %v4745_v54 = vpack.c.bf16 %v6138_v42, %v6135_v37  ;;  %v6144_v56 = vmax.f32 %v4733_v43, 0.0  ;;  %v4749_v57 = vadd.f32 %v4218_v49, %v4608_v45  ;;  %v1565_v0 = vor.u32 %v1563_v41, %v1562_v48 }
  0xee   : > { %v593_v61 = vpop.f32.mrf.mxu0  ;;  %v1985_v62 = vsel %vm1978_vm7, %v1983_v51, %v1984_v53  ;;  %v1986_v63 = vor.u32 %v1984_v53, %v1560_v39  ;;  %v4753_v1 = vsel %vm1543_vm11, %v1562_v48, %v1573_v46  ;;  %v6156_v51 = vmov 0.0|0.0  }
  0xef   : > { %v1584_v2 = vshrl.u32 %v4745_v54, 16  ;;  %v4757_v3 = vadd.f32 %v4608_v45, %v593_v61  ;;  %2315 = vrot.lane.b32.xlu0 %v4745_v54, %s4418_s19  ;;  %v4763_v6 = vsel %vm4735_vm12, 0, %v1985_v62  ;;  %v1061_v10 = vpack.c.bf16 %v6144_v56, %v6137_v47 }
  0xf0   : > { %v4219_v9 = vpop.f32.mrf.mxu0  ;;  %v4770_v11 = vsel %vm1978_vm7, %v1986_v63, %v1987_v60  ;;  %v4774_v13 = vsel %vm1543_vm11, %v4663_v7, %v1565_v0  ;;  %v1587_v18 = vshll.u32 %v4745_v54, 16  ;;  %v6132_v19 = vmax.f32 %v4749_v57, 0.0  ;;  %4042 = vmatprep.mubr.msk.bf16.mxu1 %vm2341_vm10, %v4763_v6 }
  0xf1   : > { %v4776_v17 = vrot.slane %v1584_v2, 7  ;;  %v4783_v21 = vadd.f32 %v4219_v9, %v4608_v45  ;;  %2313 = vrot.lane.b32.xlu1 %v1061_v10, %s4418_s19  ;;  %v1576_v23 = vshrl.u32 %v1061_v10, 16  ;;  %v1579_v27 = vshll.u32 %v1061_v10, 16 }
  0xf2   : > { %v596_v29 = vpop.f32.mrf.mxu0  ;;  %v6133_v33 = vmax.f32 %v4757_v3, 0.0  ;;  %v1993_v49 = vrot.slane %v1587_v18, 1 }
  0xf3   : > { %v6134_v7 = vmax.f32 %v4783_v21, 0.0  ;;  %v4788_v30 = vadd.f32 %v4608_v45, %v596_v29  ;;  %v1589_v32 = vor.u32 %v1587_v18, %v4776_v17  ;;  %v1578_v35 = vrot.slane %v1576_v23, 7 }
  0xf4   : > { %v4222_v39 = vpop.f32.mrf.mxu0  ;;  %v1990_v41 = vrot.slane %v1579_v27, 1 }
  0xf5   : > { %v1064_v44 = vpack.c.bf16 %v6134_v7, %v6132_v19  ;;  %v6136_v46 = vmax.f32 %v4788_v30, 0.0  ;;  %v4798_v48 = vadd.f32 %v4222_v39, %v4608_v45  ;;  %2305 = vrot.lane.b32.xlu1 %v6156_v51, %s4418_s19  ;;  %v1581_v60 = vor.u32 %v1579_v27, %v1578_v35 }
  0xf6   : > { %v609_v53 = vpop.f32.mrf.mxu0  ;;  %v4803_v54 = vsel %vm1978_vm7, %v1989_v40, %v1990_v41  ;;  %v1992_v28 = vor.u32 %v1990_v41, %v1576_v23  ;;  %v4806_v61 = vsel %vm1543_vm11, %v1578_v35, %v1589_v32 }
  0xf7   : > { %6172 = vst [vmem:[#allocation3_spill] sm:$0xff] %v4806_v61  ;;  %v1600_v62 = vshrl.u32 %v1064_v44, 16  ;;  %v4809_v63 = vadd.f32 %v4608_v45, %v609_v53  ;;  %v1063_v9 = vpack.c.bf16 %v6136_v46, %v6133_v33  ;;  %v4820_v18 = vsel %vm1543_vm11, %v4722_v34, %v1581_v60 }
  0xf8   : > { %v4223_v0 = vpop.f32.mrf.mxu0  ;;  %v4816_v10 = vsel %vm1978_vm7, %v1992_v28, %v1993_v49  ;;  %v1603_v27 = vshll.u32 %v1064_v44, 16  ;;  %v6139_v29 = vmax.f32 %v4798_v48, 0.0 }
  0xf9   : > { %v4822_v23 = vrot.slane %v1600_v62, 7  ;;  %v4826_v32 = vadd.f32 %v4223_v0, %v4608_v45  ;;  %2319 = vrot.lane.b32.xlu1 %v1064_v44, %s4418_s19  ;;  %v1592_v35 = vshrl.u32 %v1063_v9, 16  ;;  %v1595_v39 = vshll.u32 %v1063_v9, 16  ;;  %2317 = vrot.lane.b32.xlu0 %v1063_v9, %s4418_s19 }
  0xfa   : > { %v612_v40 = vpop.f32.mrf.mxu0  ;;  %v6141_v28 = vmax.f32 %v4809_v63, 0.0  ;;  %v1995_v0 = vor.u32 %v1993_v49, %v1584_v2 }
  0xfb   : > { %v6140_v41 = vmax.f32 %v4826_v32, 0.0  ;;  %v4832_v34 = vadd.f32 %v4608_v45, %v612_v40  ;;  %v1605_v53 = vor.u32 %v1603_v27, %v4822_v23  ;;  %v1594_v60 = vrot.slane %v1592_v35, 7 }
  0xfc   : > { %v4226_v19 = vpop.f32.mrf.mxu0  ;;  %v1996_v33 = vrot.slane %v1595_v39, 1  ;;  %v1999_v40 = vrot.slane %v1603_v27, 1 }
  0xfd   : > { %v1066_v44 = vpack.c.bf16 %v6140_v41, %v6139_v29  ;;  %v6142_v9 = vmax.f32 %v4832_v34, 0.0  ;;  %v4842_v7 = vadd.f32 %v4226_v19, %v4608_v45  ;;  %v1597_v42 = vor.u32 %v1595_v39, %v1594_v60 }
  0xfe   : > { %v625_v37 = vpop.f32.mrf.mxu0  ;;  %v4845_v46 = vsel %vm1978_vm7, %v1995_v0, %v1996_v33  ;;  %v1998_v47 = vor.u32 %v1996_v33, %v1592_v35  ;;  %v4848_v2 = vsel %vm1543_vm11, %v1594_v60, %v1605_v53 }
  0xff   : > { %6173 = vst [vmem:[#allocation4_spill] sm:$0xff] %v4845_v46  ;;  %6174 = vst [vmem:[#allocation5_spill] sm:$0xff] %v4848_v2  ;;  %v1616_v49 = vshrl.u32 %v1066_v44, 16  ;;  %2323 = vrot.lane.b32.xlu1 %v1066_v44, %s4418_s19  ;;  %v4852_v29 = vadd.f32 %v4608_v45, %v625_v37  ;;  %v1065_v19 = vpack.c.bf16 %v6142_v9, %v6141_v28  ;;  %v1619_v39 = vshll.u32 %v1066_v44, 16 }
 0x100   : > { %v4227_v41 = vpop.f32.mrf.mxu0  ;;  %v4859_v27 = vsel %vm1978_vm7, %v1998_v47, %v1999_v40  ;;  %v4863_v33 = vsel %vm1543_vm11, %v4776_v17, %v1597_v42  ;;  %v6152_v53 = vmax.f32 %v4842_v7, 0.0  ;;  %v2001_v9 = vor.u32 %v1999_v40, %v1600_v62 }
 0x101   : > { %6175 = vst [vmem:[#allocation6_spill] sm:$0xff] %v4859_v27  ;;  %6176 = vst [vmem:[#allocation7_spill] sm:$0xff] %v4863_v33  ;;  %v4865_v35 = vrot.slane %v1616_v49, 7  ;;  %v4869_v37 = vadd.f32 %v4227_v41, %v4608_v45  ;;  %v1608_v60 = vshrl.u32 %v1065_v19, 16  ;;  %v1611_v0 = vshll.u32 %v1065_v19, 16  ;;  %2321 = vrot.lane.b32.xlu0 %v1065_v19, %s4418_s19 }
 0x102   : > { %v628_v28 = vpop.f32.mrf.mxu0  ;;  %v6154_v17 = vmax.f32 %v4852_v29, 0.0  ;;  %v2005_v40 = vrot.slane %v1619_v39, 1 }
 0x103   : > { %v6153_v47 = vmax.f32 %v4869_v37, 0.0  ;;  %v4874_v14 = vadd.f32 %v4608_v45, %v628_v28  ;;  %v1621_v42 = vor.u32 %v1619_v39, %v4865_v35  ;;  %v1610_v44 = vrot.slane %v1608_v60, 7 }
 0x104   : > { %v4230_v56 = vpop.f32.mrf.mxu0  ;;  %v2002_v26 = vrot.slane %v1611_v0, 1 }
 0x105   : > { %v1068_v41 = vpack.c.bf16 %v6153_v47, %v6152_v53  ;;  %v6155_v19 = vmax.f32 %v4874_v14, 0.0  ;;  %v4884_v62 = vadd.f32 %v4230_v56, %v4608_v45  ;;  %v1613_v20 = vor.u32 %v1611_v0, %v1610_v44 }
 0x106   : > { %v641_v28 = vpop.f32.mrf.mxu0  ;;  %v4887_v15 = vsel %vm1978_vm7, %v2001_v9, %v2002_v26  ;;  %v2004_v58 = vor.u32 %v2002_v26, %v1608_v60  ;;  %v4890_v24 = vsel %vm1543_vm11, %v1610_v44, %v1621_v42 }
 0x107   : > { %6177 = vst [vmem:[#allocation8_spill] sm:$0xff] %v4887_v15  ;;  %6178 = vst [vmem:[#allocation9_spill] sm:$0xff] %v4890_v24  ;;  %v1632_v59 = vshrl.u32 %v1068_v41, 16  ;;  %2327 = vrot.lane.b32.xlu1 %v1068_v41, %s4418_s19  ;;  %v4894_v53 = vadd.f32 %v4608_v45, %v641_v28  ;;  %v1067_v56 = vpack.c.bf16 %v6155_v19, %v6154_v17  ;;  %v1635_v60 = vshll.u32 %v1068_v41, 16 }
 0x108   : > { %v4231_v47 = vpop.f32.mrf.mxu0  ;;  %v4901_v9 = vsel %vm1978_vm7, %v2004_v58, %v2005_v40  ;;  %v4905_v26 = vsel %vm1543_vm11, %v4822_v23, %v1613_v20  ;;  %v2007_v19 = vor.u32 %v2005_v40, %v1616_v49 }
 0x109   : > { %6179 = vst [vmem:[#allocation10_spill] sm:$0xff] %v4901_v9  ;;  %6180 = vst [vmem:[#allocation11_spill] sm:$0xff] %v4905_v26  ;;  %v4907_v39 = vrot.slane %v1632_v59, 7  ;;  %v4911_v42 = vadd.f32 %v4231_v47, %v4608_v45  ;;  %v1624_v44 = vshrl.u32 %v1067_v56, 16  ;;  %v1627_v28 = vshll.u32 %v1067_v56, 16  ;;  %2325 = vrot.lane.b32.xlu0 %v1067_v56, %s4418_s19 }
 0x10a   : > { %v644_v17 = vpop.f32.mrf.mxu0  ;;  %v6181_v47 = vmax.f32 %v4884_v62, 0.0  ;;  %v2011_v40 = vrot.slane %v1635_v60, 1 }
 0x10b   : > { %v6159_v58 = vmax.f32 %v4911_v42, 0.0  ;;  %v4916_v51 = vadd.f32 %v4608_v45, %v644_v17  ;;  %v1637_v20 = vor.u32 %v1635_v60, %v4907_v39  ;;  %v1626_v41 = vrot.slane %v1624_v44, 7 }
 0x10c   : > { %v4234_v0 = vpop.f32.mrf.mxu0  ;;  %v2008_v5 = vrot.slane %v1627_v28, 1 }
 0x10d   : > { %v1070_v24 = vpack.c.bf16 %v6159_v58, %v6181_v47  ;;  %v6160_v56 = vmax.f32 %v4916_v51, 0.0  ;;  %v4926_v49 = vadd.f32 %v4234_v0, %v4608_v45  ;;  %v1629_v23 = vor.u32 %v1627_v28, %v1626_v41 }
 0x10e   : > { %v657_v17 = vpop.f32.mrf.mxu0  ;;  %v4929_v26 = vsel %vm1978_vm7, %v2007_v19, %v2008_v5  ;;  %v2010_v9 = vor.u32 %v2008_v5, %v1624_v44  ;;  %v4932_v2 = vsel %vm1543_vm11, %v1626_v41, %v1637_v20  ;;  %v6184_v0 = vmax.f32 %v4894_v53, 0.0 }
 0x10f   : > { %6182 = vst [vmem:[#allocation12_spill] sm:$0xff] %v4929_v26  ;;  %6183 = vst [vmem:[#allocation13_spill] sm:$0xff] %v4932_v2  ;;  %v1648_v15 = vshrl.u32 %v1070_v24, 16  ;;  %v4935_v33 = vadd.f32 %v4608_v45, %v657_v17  ;;  %2331 = vrot.lane.b32.xlu1 %v1070_v24, %s4418_s19  ;;  %v4947_v5 = vsel %vm1543_vm11, %v4865_v35, %v1629_v23  ;;  %v1651_v28 = vshll.u32 %v1070_v24, 16 }
 0x110   : > { %v4235_v47 = vpop.f32.mrf.mxu0  ;;  %v1069_v60 = vpack.c.bf16 %v6160_v56, %v6184_v0  ;;  %v4943_v19 = vsel %vm1978_vm7, %v2010_v9, %v2011_v40  ;;  %6186 = vst [vmem:[#allocation15_spill] sm:$0xff] %v4947_v5  ;;  %v2013_v0 = vor.u32 %v2011_v40, %v1632_v59 }
 0x111   : > { %6185 = vst [vmem:[#allocation14_spill] sm:$0xff] %v4943_v19  ;;  %v1650_v44 = vrot.slane %v1648_v15, 7  ;;  %v4951_v41 = vadd.f32 %v4235_v47, %v4608_v45  ;;  %v6187_v47 = vmax.f32 %v4926_v49, 0.0  ;;  %v2017_v26 = vrot.slane %v1651_v28, 1 }
 0x112   : > { %v1640_v17 = vshrl.u32 %v1069_v60, 16  ;;  %v1643_v58 = vshll.u32 %v1069_v60, 16  ;;  %2329 = vrot.lane.b32.xlu0 %v1069_v60, %s4418_s19  ;;  %v660_v2 = vpop.f32.mrf.mxu0 }
 0x113   : > { %v6161_v56 = vmax.f32 %v4951_v41, 0.0  ;;  %v4957_v35 = vadd.f32 %v4608_v45, %v660_v2  ;;  %v1653_v23 = vor.u32 %v1651_v28, %v1650_v44 }
 0x114   : > { %v1642_v24 = vrot.slane %v1640_v17, 7  ;;  %v4238_v5 = vpop.f32.mrf.mxu0  ;;  %v2014_v20 = vrot.slane %v1643_v58, 1 }
 0x115   : > { %v1072_v19 = vpack.c.bf16 %v6161_v56, %v6187_v47  ;;  %v6162_v60 = vmax.f32 %v4957_v35, 0.0  ;;  %v6189_v5 = vmax.f32 %v4935_v33, 0.0 }
 0x116   : > { %v673_v59 = vpop.f32.mrf.mxu0  ;;  %v4965_v40 = vsel %vm1978_vm7, %v2013_v0, %v2014_v20  ;;  %v2016_v9 = vor.u32 %v2014_v20, %v1640_v17  ;;  %v1645_v27 = vor.u32 %v1643_v58, %v1642_v24  ;;  %v4968_v2 = vsel %vm1543_vm11, %v1642_v24, %v1653_v23 }
 0x117   : > { %6188 = vst [vmem:[#allocation16_spill] sm:$0xff] %v4968_v2  ;;  %v1664_v61 = vshrl.u32 %v1072_v19, 16  ;;  %v1071_v46 = vpack.c.bf16 %v6162_v60, %v6189_v5  ;;  %v4975_v47 = vadd.f32 %v4608_v45, %v673_v59  ;;  %2335 = vrot.lane.b32.xlu1 %v1072_v19, %s4418_s19  ;;  %v1667_v28 = vshll.u32 %v1072_v19, 16 }
 0x118   : > { %v4239_v56 = vpop.f32.mrf.mxu0  ;;  %v4979_v0 = vsel %vm1978_vm7, %v2016_v9, %v2017_v26  ;;  %v4983_v58 = vsel %vm1543_vm11, %v4907_v39, %v1645_v27  ;;  %v2019_v24 = vor.u32 %v2017_v26, %v1648_v15 }
 0x119   : > { %6190 = vst [vmem:[#allocation17_spill] sm:$0xff] %v4983_v58  ;;  %v1666_v20 = vrot.slane %v1664_v61, 7  ;;  %v1656_v17 = vshrl.u32 %v1071_v46, 16  ;;  %v1659_v23 = vshll.u32 %v1071_v46, 16  ;;  %2333 = vrot.lane.b32.xlu0 %v1071_v46, %s4418_s19  ;;  %v720_v59 = vmax.f32 %v4975_v47, 0.0 }
 0x11a   : > { %v676_v5 = vpop.f32.mrf.mxu0  ;;  %v6191_v56 = vmov 0.0|0.0   ;;  %v2023_v27 = vrot.slane %v1667_v28, 1 }
 0x11b   : > { %v1658_v60 = vrot.slane %v1656_v17, 7  ;;  %v4988_v19 = vadd.f32 %v4608_v45, %v676_v5  ;;  %2339 = vrot.lane.b32.xlu1 %v6191_v56, %s4418_s19  ;;  %v2020_v9 = vrot.slane %v1659_v23, 1  ;;  %v1669_v2 = vor.u32 %v1667_v28, %v1666_v20 }
 0x11c   : > { %v6192_v5 = vmax.f32 %v4627_v52, 0.0  ;;  %v6194_v52 = vmov 0  }
 0x11d   : > { %v721_v39 = vmax.f32 %v4988_v19, 0.0  ;;  %v4994_v58 = vsel %vm1978_vm7, %v2019_v24, %v2020_v9  ;;  %v2022_v46 = vor.u32 %v2020_v9, %v1656_v17  ;;  %v1661_v15 = vor.u32 %v1659_v23, %v1658_v60  ;;  %v5225_v19 = vld [vmem:[%s6127_s3 + $0xe0] sm:$0xff]  }
 0x11e   : > { %v4997_v26 = vsel %vm1543_vm11, %v1658_v60, %v1669_v2  ;;  %v2025_v2 = vor.u32 %v2023_v27, %v1664_v61  ;;  %v6193_v23 = vmax.f32 %v4685_v16, 0.0  ;;  %v5022_v56 = vrot.slane %v6194_v52, 7 }
 0x11f   : > { %v5003_v45 = vpack.c.bf16 %v721_v39, %v720_v59  ;;  %3642 = vrot.lane.b32.xlu1 %v6192_v5, %s4418_s19  ;;  %v5009_v28 = vsel %vm1978_vm7, %v2022_v46, %v2023_v27  ;;  %v5012_v24 = vsel %vm1543_vm11, %v1650_v44, %v1661_v15  ;;  %v6195_v46 = vmax.f32 %v4620_v50, 0.0 }
 0x120   : > { %v6196_v27 = vmax.f32 %v4666_v8, 0.0  ;;  %v6197_v50 = vmax.f32 %v4680_v12, 0.0  ;;  %v6201_v8 = vmax.f32 %v4716_v31, 0.0  ;;  %v6202_v12 = vmax.f32 %v4788_v30, 0.0 }
 0x121   : > { %v1672_v17 = vshrl.u32 %v5003_v45, 16  ;;  %v1675_v60 = vshll.u32 %v5003_v45, 16  ;;  %2337 = vrot.lane.b32.xlu0 %v5003_v45, %s4418_s19  ;;  %v6206_v31 = vmax.f32 %v4832_v34, 0.0  ;;  %v730_v30 = vadd.s32 40, %v4581_v36 }
 0x122   : > { %v6210_v34 = vmax.f32 %v4874_v14, 0.0  ;;  %v6213_v14 = vmax.f32 %v4852_v29, 0.0  ;;  %v6217_v29 = vmax.f32 %v4842_v7, 0.0  ;;  %v5132_v7 = vld [vmem:[%s6127_s3 + $0xf8] sm:$0xff]  }
 0x123   : > { %3646 = vrot.lane.b32.xlu1 %v6193_v23, %s4418_s19  ;;  %v1674_v9 = vrot.slane %v1672_v17, 7  ;;  %v5026_v44 = vrot.slane %v1675_v60, 1  ;;  %v6198_v23 = vmax.f32 %v4733_v43, 0.0  ;;  %v6203_v43 = vmax.f32 %v4703_v25, 0.0 }
 0x124   : > { %v6207_v25 = vmax.f32 %v4749_v57, 0.0  ;;  %v729_v57 = vadd.s32 32, %v4581_v36 }
 0x125   : > { %3640 = vrot.lane.b32.xlu0 %v6195_v46, %s4418_s19  ;;  %v5033_v15 = vsel %vm1543_vm11, %v1674_v9, %v5022_v56  ;;  %v5037_v16 = vsel %vm1978_vm7, %v2025_v2, %v5026_v44  ;;  %v1677_v61 = vor.u32 %v1675_v60, %v1674_v9  ;;  %v6199_v2 = vmax.f32 %v4656_v4, 0.0 }
 0x126   : > { %v6200_v60 = vmax.f32 %v4727_v38, 0.0  ;;  %v6204_v4 = vmax.f32 %v4783_v21, 0.0  ;;  %v6205_v38 = vmax.f32 %v4757_v3, 0.0  ;;  %v6208_v21 = vmax.f32 %v4826_v32, 0.0 }
 0x127   : > { %3650 = vrot.lane.b32.xlu1 %v6196_v27, %s4418_s19  ;;  %v5043_v5 = vsel %vm1543_vm11, %v1666_v20, %v1677_v61  ;;  %v727_v20 = vadd.s32 16, %v4581_v36  ;;  %v1114_v46 = vand.u32 15, %v730_v30  ;;  %v6209_v3 = vmax.f32 %v4809_v63, 0.0 }
 0x128   : > { %v6211_v61 = vmax.f32 %v4798_v48, 0.0  ;;  %v732_v32 = vadd.s32 56, %v4581_v36  ;;  %v6212_v63 = vmax.f32 %v4869_v37, 0.0 }
 0x129   : > { %3644 = vrot.lane.b32.xlu0 %v6197_v50, %s4418_s19  ;;  %v1093_v9 = vand.u32 15, %v727_v20  ;;  %vm1947_vm14 = vcmp.eq.s32.totalorder %v1114_v46, 15  ;;  %v1107_v50 = vand.u32 15, %v729_v57  ;;  %v6222_v46 = vmax.f32 %v4957_v35, 0.0 }
 0x12a   : > { %vm2130_vm0 = vmpackc.low %vm1947_vm14, %vm1947_vm14  ;;  %v1128_v48 = vand.u32 15, %v732_v32  ;;  %v733_v57 = vadd.s32 64, %v4581_v36 }
 0x12b   : > { %3654 = vrot.lane.b32.xlu1 %v6198_v23, %s4418_s19  ;;  %vm1509_vm13 = vcmp.eq.s32.totalorder %v1093_v9, 0  ;;  %v2166_v23 = vsel %vm2130_vm0, 65537, %v6194_v52  ;;  %vm5107_vm1 = vcmp.eq.s32.totalorder %v1107_v50, 0  ;;  %v6230_v50 = vmax.f32 %v4951_v41, 0.0 }
 0x12c   : > { %vm1782_vm15 = vmpackc.low %vm1509_vm13, %vm1509_vm13  ;;  %vm5119_vm3 = vcmp.eq.s32.totalorder %v1128_v48, 15  ;;  %v6231_v41 = vmax.f32 %v4935_v33, 0.0  ;;  %v735_v33 = vadd.s32 80, %v4581_v36 }
 0x12d   : > { %3648 = vrot.lane.b32.xlu0 %v6199_v2, %s4418_s19  ;;  %v1818_v27 = vsel %vm1782_vm15, 65537, %v6194_v52  ;;  %vm1784_vm4 = vmpackc.low %vm5107_vm1, %vm5107_vm1 }
 0x12e   : > { %v3971_v2 = vcombine.low %v1818_v27, %v4633_v55  ;;  %vm2132_vm6 = vmpackc.low %vm5119_vm3, %vm5119_vm3  ;;  %v1820_v9 = vsel %vm1784_vm4, 65537, %v6194_v52  ;;  %v736_v27 = vadd.s32 88, %v4581_v36  ;;  %vm1705_vm3 = vcmask 1040384  }
 0x12f   : > { %3658 = vrot.lane.b32.xlu1 %v6200_v60, %s4418_s19  ;;  %v6214_v60 = vmax.f32 %v4916_v51, 0.0 }
 0x130   : > { %vm1907_vm2 = vcmp.ne.s16.totalorder %v3971_v2, 0 }
 0x131   : > { %3652 = vrot.lane.b32.xlu0 %v6201_v8, %s4418_s19  ;;  %v3990_v8 = vcombine.low %v4633_v55, %v2166_v23  ;;  %v1135_v23 = vand.u32 15, %v733_v57 }
 0x133   : > { %3662 = vrot.lane.b32.xlu1 %v6202_v12, %s4418_s19  ;;  %v731_v12 = vadd.s32 48, %v4581_v36  ;;  %vm2253_vm5 = vcmp.ne.s16.totalorder %v3990_v8, 0 }
 0x135   : > { %3656 = vrot.lane.b32.xlu0 %v6203_v43, %s4418_s19  ;;  %v734_v43 = vadd.s32 72, %v4581_v36 }
 0x137   : > { %3666 = vrot.lane.b32.xlu1 %v6204_v4, %s4418_s19  ;;  %v1558_v4 = vsel %vm1543_vm11, %v5022_v56, %v4693_v22  ;;  %v1121_v22 = vand.u32 15, %v731_v12 }
 0x138   : > { %v1925_v30 = vsel %vm1907_vm2, 0, %v1558_v4  ;;  %vm5218_vm2 = vcmp.eq.s32.totalorder %v1135_v23, 0 }
 0x139   : > { %3660 = vrot.lane.b32.xlu0 %v6205_v38, %s4418_s19  ;;  %v6220_v38 = vmax.f32 %v4911_v42, 0.0  ;;  %v1142_v42 = vand.u32 15, %v734_v43  ;;  %vm5161_vm8 = vcmp.eq.s32.totalorder %v1121_v22, 0  ;;  %v6251_v43 = vld [vmem:[#allocation4_spill] sm:$0xff] }
 0x13a   : > { %vm1786_vm13 = vmpackc.low %vm5161_vm8, %vm5161_vm8 }
 0x13b   : > { %3670 = vrot.lane.b32.xlu1 %v6206_v31, %s4418_s19  ;;  %v6221_v31 = vmax.f32 %v4894_v53, 0.0  ;;  %v5150_v53 = vsel %vm2253_vm5, 0, %v4770_v11  ;;  %v6225_v11 = vmax.f32 %v4884_v62, 0.0  ;;  %vm5171_vm9 = vcmp.eq.s32.totalorder %v1142_v42, 15  ;;  %vm1788_vm5 = vmpackc.low %vm5218_vm2, %vm5218_vm2  ;;  %v5260_v42 = vld [vmem:[%s6127_s3 + $0xd8] sm:$0xff]  }
 0x13c   : > { %vm2134_vm14 = vmpackc.low %vm5171_vm9, %vm5171_vm9  ;;  %v1822_v48 = vsel %vm1786_vm13, 65537, %v6194_v52 }
 0x13d   : > { %3664 = vrot.lane.b32.xlu0 %v6207_v25, %s4418_s19  ;;  %v2170_v12 = vsel %vm2134_vm14, 65537, %v6194_v52  ;;  %v3973_v4 = vcombine.low %v1822_v48, %v4633_v55 }
 0x13e   : > { %v3992_v22 = vcombine.low %v4633_v55, %v2170_v12 }
 0x13f   : > { %3674 = vrot.lane.b32.xlu1 %v6208_v21, %s4418_s19  ;;  %v1079_v21 = vand.u32 15, %v4581_v36  ;;  %vm5265_vm8 = vcmp.ne.s16.totalorder %v3973_v4, 0  ;;  %v746_v4 = vadd.s32 168, %v4581_v36 }
 0x140   : > { %vm2255_vm9 = vcmp.ne.s16.totalorder %v3992_v22, 0 }
 0x141   : > { %3668 = vrot.lane.b32.xlu0 %v6209_v3, %s4418_s19  ;;  %v2168_v3 = vsel %vm2132_vm6, 65537, %v6194_v52  ;;  %vm5175_vm12 = vcmp.eq.s32.totalorder %v1079_v21, 0  ;;  %vm5252_vm6 = vmand %vm1705_vm3, %vm1543_vm11  ;;  %v1824_v21 = vsel %vm1788_vm5, 65537, %v6194_v52  ;;  %v5299_v32 = vsel %vm2255_vm9, 0, %v4816_v10  ;;  %v5316_v10 = vld [vmem:[%s6127_s3 + $0xc8] sm:$0xff]  }
 0x142   : > { %v3991_v62 = vcombine.low %v4633_v55, %v2168_v3  ;;  %vm1780_vm0 = vmpackc.low %vm5175_vm12, %vm5175_vm12  ;;  %v1707_v3 = vsel %vm5252_vm6, 0, %v5022_v56  ;;  %v5290_v56 = vld [vmem:[%s6127_s3 + $0xd0] sm:$0xff]  }
 0x143   : > { %3678 = vrot.lane.b32.xlu1 %v6210_v34, %s4418_s19  ;;  %v5159_v34 = vld [vmem:[%s6127_s3 + $0xf0] sm:$0xff]  }
 0x144   : > { %vm2254_vm1 = vcmp.ne.s16.totalorder %v3991_v62, 0 }
 0x145   : > { %3672 = vrot.lane.b32.xlu0 %v6211_v61, %s4418_s19  ;;  %v3972_v61 = vcombine.low %v1820_v9, %v4633_v55  ;;  %v5237_v51 = vsel %vm2254_vm1, 0, %v4803_v54  ;;  %v6256_v9 = vld [vmem:[#allocation3_spill] sm:$0xff] }
 0x147   : > { %3682 = vrot.lane.b32.xlu1 %v6212_v63, %s4418_s19  ;;  %vm5199_vm15 = vcmp.ne.s16.totalorder %v3972_v61, 0 }
 0x148   : > { %v1926_v37 = vsel %vm5199_vm15, 0, %v4774_v13 }
 0x149   : > { %3676 = vrot.lane.b32.xlu0 %v6213_v14, %s4418_s19  ;;  %v5194_v14 = vld [vmem:[%s6127_s3 + $0xe8] sm:$0xff]  }
 0x14b   : > { %3686 = vrot.lane.b32.xlu1 %v6214_v60, %s4418_s19  ;;  %v1156_v60 = vand.u32 15, %v736_v27 }
 0x14d   : > { %3680 = vrot.lane.b32.xlu0 %v6217_v29, %s4418_s19  ;;  %v1816_v29 = vsel %vm1780_vm0, 65537, %v6194_v52  ;;  %vm5239_vm4 = vcmp.eq.s32.totalorder %v1156_v60, 15 }
 0x14e   : > { %vm2136_vm11 = vmpackc.low %vm5239_vm4, %vm5239_vm4 }
 0x14f   : > { %3690 = vrot.lane.b32.xlu1 %v6220_v38, %s4418_s19  ;;  %v2172_v35 = vsel %vm2136_vm11, 65537, %v6194_v52  ;;  %v742_v38 = vadd.s32 136, %v4581_v36 }
 0x150   : > { %v3993_v62 = vcombine.low %v4633_v55, %v2172_v35  ;;  %v6259_v35 = vld [vmem:[#allocation6_spill] sm:$0xff] }
 0x151   : > { %v2308_v20 = vpop.permute.xlu0 %2307  ;;  %3684 = vrot.lane.b32.xlu0 %v6221_v31, %s4418_s19 }
 0x152   : > { %v5141_v25 = vsel %vm2341_vm10, %v1925_v30, %v2308_v20  ;;  %v3970_v20 = vcombine.low %v1816_v29, %v4633_v55  ;;  %v1149_v30 = vand.u32 15, %v735_v33  ;;  %vm2256_vm2 = vcmp.ne.s16.totalorder %v3993_v62, 0 }
 0x153   : > { %3694 = vrot.lane.b32.xlu1 %v6222_v46, %s4418_s19  ;;  %2616 = vmatmul.mubr.bf16.vlgmr.msra.gmra.mxu1 %v5141_v25  ;;  %v739_v29 = vadd.s32 112, %v4581_v36 }
 0x154   : > { %4043 = vmatprep.mubr.msk.bf16.mxu1 %vm2341_vm10, %v5150_v53  ;;  %4292 = vmatpush1.bf16.msra.mxu1 %v5132_v7  ;;  %vm1906_vm12 = vcmp.ne.s16.totalorder %v3970_v20, 0  ;;  %vm5281_vm13 = vcmp.eq.s32.totalorder %v1149_v30, 0  ;;  %v5373_v20 = vld [vmem:[%s6127_s3 + $0x118] sm:$0xff]   ;;  %v1198_v30 = vand.u32 15, %v742_v38 }
 0x155   : > { %3688 = vrot.lane.b32.xlu0 %v6225_v11, %s4418_s19  ;;  %4281 = vmatprep.subr.bf16.mxu1 %v6194_v52  ;;  %v737_v11 = vadd.s32 96, %v4581_v36  ;;  %v1924_v63 = vsel %vm1906_vm12, 0, %v1707_v3  ;;  %vm1790_vm15 = vmpackc.low %vm5281_vm13, %vm5281_vm13  ;;  %v1177_v22 = vand.u32 15, %v739_v29  ;;  %v6267_v29 = vld [vmem:[#allocation8_spill] sm:$0xff] }
 0x156   : > { %v1826_v60 = vsel %vm1790_vm15, 65537, %v6194_v52  ;;  %vm5413_vm12 = vcmp.eq.s32.totalorder %v1198_v30, 15 }
 0x157   : > { %3698 = vrot.lane.b32.xlu1 %v6230_v50, %s4418_s19  ;;  %v740_v50 = vadd.s32 120, %v4581_v36  ;;  %vm5392_vm9 = vcmp.eq.s32.totalorder %v1177_v22, 0  ;;  %vm2142_vm15 = vmpackc.low %vm5413_vm12, %vm5413_vm12 }
 0x158   : > { %4293 = vmatpush1.bf16.msra.mxu1 %v5159_v34  ;;  %vm1794_vm13 = vmpackc.low %vm5392_vm9, %vm5392_vm9 }
 0x159   : > { %3692 = vrot.lane.b32.xlu0 %v6231_v41, %s4418_s19  ;;  %4282 = vmatprep.subr.bf16.mxu1 %v6194_v52  ;;  %v2312_v31 = vpop.permute.xlu1 %2311  ;;  %v1163_v41 = vand.u32 15, %v737_v11  ;;  %v1184_v33 = vand.u32 15, %v740_v50  ;;  %v5430_v50 = vld [vmem:[%s6127_s3 + $0x108] sm:$0xff]  }
 0x15b   : > { %3702 = vrot.lane.b32.xlu1 %v721_v39, %s4418_s19  ;;  %v2310_v8 = vpop.permute.xlu0 %2309  ;;  %v6236_v39 = vmax.f32 %v4926_v49, 0.0  ;;  %v738_v49 = vadd.s32 104, %v4581_v36  ;;  %vm5335_vm3 = vcmp.eq.s32.totalorder %v1163_v41, 0  ;;  %vm5356_vm4 = vcmp.eq.s32.totalorder %v1184_v33, 15 }
 0x15c   : > { %4294 = vmatpush1.bf16.msra.mxu1 %v5194_v14  ;;  %v5231_v13 = vsel %vm2341_vm10, %v1926_v37, %v2310_v8  ;;  %vm1792_vm5 = vmpackc.low %vm5335_vm3, %vm5335_vm3 }
 0x15d   : > { %3696 = vrot.lane.b32.xlu0 %v6236_v39, %s4418_s19  ;;  %4283 = vmatprep.subr.bf16.mxu1 %v6194_v52  ;;  %v1170_v46 = vand.u32 15, %v738_v49  ;;  %v5354_v39 = vsel %vm2256_vm2, 0, %v6251_v43  ;;  %v1828_v54 = vsel %vm1792_vm5, 65537, %v6194_v52 }
 0x15e   : > { %2624 = vmatmul.mubr.bf16.gmra.mxu1 %v5231_v13 }
 0x15f   : > { %4044 = vmatprep.mubr.msk.bf16.mxu1 %vm2341_vm10, %v5237_v51  ;;  %vm5301_vm14 = vcmp.eq.s32.totalorder %v1170_v46, 15 }
 0x160   : > { %4295 = vmatpush1.bf16.msra.mxu1 %v5225_v19  ;;  %vm2138_vm1 = vmpackc.low %vm5301_vm14, %vm5301_vm14 }
 0x161   : > { %3700 = vrot.lane.b32.xlu0 %v720_v59, %s4418_s19  ;;  %4284 = vmatprep.subr.bf16.mxu1 %v6194_v52  ;;  %v1927_v59 = vsel %vm5265_vm8, 0, %v4753_v1  ;;  %v3974_v1 = vcombine.low %v1824_v21, %v4633_v55  ;;  %v2174_v37 = vsel %vm2138_vm1, 65537, %v6194_v52  ;;  %vm2140_vm8 = vmpackc.low %vm5356_vm4, %vm5356_vm4 }
 0x162   : > { %v5293_v61 = vsel %vm2341_vm10, %v1927_v59, %v2312_v31  ;;  %v3994_v49 = vcombine.low %v4633_v55, %v2174_v37  ;;  %v2176_v46 = vsel %vm2140_vm8, 65537, %v6194_v52  ;;  %v3976_v59 = vcombine.low %v1828_v54, %v4633_v55 }
 0x163   : > { %v2314_v47 = vpop.permute.xlu1 %2313  ;;  %vm5319_vm0 = vcmp.ne.s16.totalorder %v3974_v1, 0  ;;  %v744_v1 = vadd.s32 152, %v4581_v36 }
 0x164   : > { %4296 = vmatpush1.bf16.msra.mxu1 %v5260_v42  ;;  %v1928_v8 = vsel %vm5319_vm0, 0, %v4820_v18  ;;  %v3975_v18 = vcombine.low %v1826_v60, %v4633_v55  ;;  %vm2257_vm11 = vcmp.ne.s16.totalorder %v3994_v49, 0  ;;  %vm5432_vm14 = vcmp.ne.s16.totalorder %v3976_v59, 0 }
 0x165   : > { %4285 = vmatprep.subr.bf16.mxu1 %v6194_v52  ;;  %v5411_v57 = vsel %vm2257_vm11, 0, %v6259_v35  ;;  %v1212_v41 = vand.u32 15, %v744_v1  ;;  %v2178_v60 = vsel %vm2142_vm15, 65537, %v6194_v52  ;;  %v748_v35 = vadd.s32 184, %v4581_v36 }
 0x166   : > { %2632 = vmatmul.mubr.bf16.gmra.mxu1 %v5293_v61  ;;  %vm5375_vm6 = vcmp.ne.s16.totalorder %v3975_v18, 0  ;;  %v3996_v38 = vcombine.low %v4633_v55, %v2178_v60 }
 0x167   : > { %4045 = vmatprep.mubr.msk.bf16.mxu1 %vm2341_vm10, %v5299_v32  ;;  %v2306_v23 = vpop.permute.xlu1 %2305  ;;  %v1929_v21 = vsel %vm5375_vm6, 0, %v6256_v9  ;;  %vm5470_vm2 = vcmp.eq.s32.totalorder %v1212_v41, 15  ;;  %v1240_v62 = vand.u32 15, %v748_v35 }
 0x168   : > { %4297 = vmatpush1.bf16.msra.mxu1 %v5290_v56  ;;  %v2344_v2 = vsel %vm2341_vm10, %v1924_v63, %v2306_v23  ;;  %v3995_v63 = vcombine.low %v4633_v55, %v2176_v46  ;;  %v1830_v23 = vsel %vm1794_vm13, 65537, %v6194_v52  ;;  %vm2144_vm5 = vmpackc.low %vm5470_vm2, %vm5470_vm2  ;;  %vm2259_vm6 = vcmp.ne.s16.totalorder %v3996_v38, 0 }
 0x169   : > { %4286 = vmatprep.subr.bf16.mxu1 %v6194_v52  ;;  %2852 = vmatmul.mubr.bf16.vlgmr.msra.gmra.mxu0 %v2344_v2  ;;  %v6264_v2 = vld [vmem:[#allocation7_spill] sm:$0xff]  ;;  %v3977_v12 = vcombine.low %v1830_v23, %v4633_v55  ;;  %v2180_v30 = vsel %vm2144_vm5, 65537, %v6194_v52 }
 0x16a   : > { %4071 = vmatprep.mubr.msk.bf16.mxu0 %vm2341_vm10, %v4763_v6  ;;  %3081 = vmatpush1.bf16.msra.mxu0 %v5132_v7  ;;  %v5345_v6 = vld [vmem:[%s6127_s3 + $0xc0] sm:$0xff]   ;;  %v5348_v7 = vsel %vm2341_vm10, %v1928_v8, %v2314_v47  ;;  %vm2258_vm0 = vcmp.ne.s16.totalorder %v3995_v63, 0  ;;  %v1930_v48 = vsel %vm5432_vm14, 0, %v6264_v2  ;;  %v743_v8 = vadd.s32 144, %v4581_v36 }
 0x16b   : > { %3082 = vmatprep.subr.bf16.mxu0 %v6194_v52  ;;  %v5468_v18 = vsel %vm2258_vm0, 0, %v6267_v29  ;;  %vm1913_vm4 = vcmp.ne.s16.totalorder %v3977_v12, 0  ;;  %v2320_v22 = vpop.permute.xlu1 %2319  ;;  %v3997_v11 = vcombine.low %v4633_v55, %v2180_v30  ;;  %v747_v2 = vadd.s32 176, %v4581_v36 }
 0x16c   : > { %4298 = vmatpush1.bf16.msra.mxu1 %v5316_v10  ;;  %v1205_v49 = vand.u32 15, %v743_v8  ;;  %vm5545_vm0 = vcmp.eq.s32.totalorder %v1240_v62, 15  ;;  %v750_v12 = vadd.s32 200, %v4581_v36 }
 0x16d   : > { %4287 = vmatprep.subr.bf16.mxu1 %v6194_v52  ;;  %vm2260_vm14 = vcmp.ne.s16.totalorder %v3997_v11, 0  ;;  %v1233_v43 = vand.u32 15, %v747_v2 }
 0x16e   : > { %2640 = vmatmul.mubr.bf16.gmra.mxu1 %v5348_v7  ;;  %3083 = vmatpush1.bf16.msra.mxu0 %v5159_v34  ;;  %v2316_v34 = vpop.permute.xlu0 %2315  ;;  %vm5494_vm8 = vcmp.eq.s32.totalorder %v1205_v49, 0  ;;  %v1254_v49 = vand.u32 15, %v750_v12 }
 0x16f   : > { %4046 = vmatprep.mubr.msk.bf16.mxu1 %vm2341_vm10, %v5354_v39  ;;  %3084 = vmatprep.subr.bf16.mxu0 %v6194_v52  ;;  %v5405_v47 = vsel %vm2341_vm10, %v1929_v21, %v2316_v34  ;;  %v1226_v34 = vand.u32 15, %v746_v4  ;;  %v745_v21 = vadd.s32 160, %v4581_v36  ;;  %vm1798_vm9 = vmpackc.low %vm5494_vm8, %vm5494_vm8  ;;  %vm5568_vm5 = vcmp.eq.s32.totalorder %v1233_v43, 0  ;;  %v6293_v43 = vld [vmem:[#allocation13_spill] sm:$0xff] }
 0x170   : > { %4299 = vmatpush1.bf16.msra.mxu1 %v5345_v6  ;;  %vm1802_vm8 = vmpackc.low %vm5568_vm5, %vm5568_vm5 }
 0x171   : > { %4288 = vmatprep.subr.bf16.mxu1 %v6194_v52  ;;  %2860 = vmatmul.mubr.bf16.gmra.mxu0 %v5141_v25  ;;  %v741_v25 = vadd.s32 128, %v4581_v36  ;;  %vm5508_vm11 = vcmp.eq.s32.totalorder %v1226_v34, 15  ;;  %v1219_v1 = vand.u32 15, %v745_v21  ;;  %v2324_v4 = vpop.permute.xlu1 %2323  ;;  %v1838_v11 = vsel %vm1802_vm8, 65537, %v6194_v52 }
 0x172   : > { %4072 = vmatprep.mubr.msk.bf16.mxu0 %vm2341_vm10, %v5150_v53  ;;  %3085 = vmatpush1.bf16.msra.mxu0 %v5194_v14  ;;  %v5402_v14 = vld [vmem:[%s6127_s3 + $0x110] sm:$0xff]   ;;  %vm2146_vm13 = vmpackc.low %vm5508_vm11, %vm5508_vm11 }
 0x173   : > { %3086 = vmatprep.subr.bf16.mxu0 %v6194_v52  ;;  %v1191_v27 = vand.u32 15, %v741_v25  ;;  %v2182_v23 = vsel %vm2146_vm13, 65537, %v6194_v52  ;;  %vm5531_vm15 = vcmp.eq.s32.totalorder %v1219_v1, 0 }
 0x174   : > { %4300 = vmatpush2.bf16.msra.mxu1 %v5373_v20  ;;  %v3998_v29 = vcombine.low %v4633_v55, %v2182_v23  ;;  %v3981_v23 = vcombine.low %v1838_v11, %v4633_v55 }
 0x175   : > { %4289 = vmatprep.subr.bf16.mxu1 %v6194_v52  ;;  %vm5449_vm1 = vcmp.eq.s32.totalorder %v1191_v27, 0  ;;  %v1834_v27 = vsel %vm1798_vm9, 65537, %v6194_v52 }
 0x176   : > { %2648 = vmatmul.mubr.bf16.gmra.mxu1 %v5405_v47  ;;  %3087 = vmatpush1.bf16.msra.mxu0 %v5225_v19  ;;  %v2318_v19 = vpop.permute.xlu0 %2317  ;;  %vm1796_vm3 = vmpackc.low %vm5449_vm1, %vm5449_vm1  ;;  %v3979_v60 = vcombine.low %v1834_v27, %v4633_v55 }
 0x177   : > { %4047 = vmatprep.mubr.msk.bf16.mxu1 %vm2341_vm10, %v5411_v57  ;;  %3088 = vmatprep.subr.bf16.mxu0 %v6194_v52  ;;  %v5462_v37 = vsel %vm2341_vm10, %v1930_v48, %v2318_v19  ;;  %v1832_v31 = vsel %vm1796_vm3, 65537, %v6194_v52  ;;  %vm1800_vm1 = vmpackc.low %vm5531_vm15, %vm5531_vm15 }
 0x178   : > { %4301 = vmatpush2.bf16.msra.mxu1 %v5402_v14  ;;  %v3978_v3 = vcombine.low %v1832_v31, %v4633_v55  ;;  %vm1915_vm2 = vcmp.ne.s16.totalorder %v3979_v60, 0  ;;  %vm2148_vm3 = vmpackc.low %vm5545_vm0, %vm5545_vm0  ;;  %v1836_v38 = vsel %vm1800_vm1, 65537, %v6194_v52  ;;  %v754_v60 = vadd.s32 232, %v4581_v36 }
 0x179   : > { %4290 = vmatprep.subr.bf16.mxu1 %v6194_v52  ;;  %2868 = vmatmul.mubr.bf16.gmra.mxu0 %v5231_v13  ;;  %v2184_v31 = vsel %vm2148_vm3, 65537, %v6194_v52  ;;  %v3980_v30 = vcombine.low %v1836_v38, %v4633_v55  ;;  %vm1917_vm0 = vcmp.ne.s16.totalorder %v3981_v23, 0  ;;  %v758_v23 = vadd.s32 264, %v4581_v36 }
 0x17a   : > { %4073 = vmatprep.mubr.msk.bf16.mxu0 %vm2341_vm10, %v5237_v51  ;;  %3089 = vmatpush1.bf16.msra.mxu0 %v5260_v42  ;;  %v5459_v42 = vld [vmem:[%s6127_s3 + $0x100] sm:$0xff]   ;;  %vm1914_vm12 = vcmp.ne.s16.totalorder %v3978_v3, 0  ;;  %v2322_v63 = vpop.permute.xlu0 %2321  ;;  %v752_v3 = vadd.s32 216, %v4581_v36 }
 0x17b   : > { %3090 = vmatprep.subr.bf16.mxu0 %v6194_v52  ;;  %vm1916_vm11 = vcmp.ne.s16.totalorder %v3980_v30, 0  ;;  %v756_v30 = vadd.s32 248, %v4581_v36 }
 0x17c   : > { %4302 = vmatpush2.bf16.msra.mxu1 %v5430_v50  ;;  %v1268_v1 = vand.u32 15, %v752_v3 }
 0x17d   : > { %4291 = vmatprep.subr.bf16.mxu1 %v6194_v52 }
 0x17e   : > { %2656 = vmatmul.mubr.bf16.gmra.mxu1 %v5462_v37  ;;  %3091 = vmatpush1.bf16.msra.mxu0 %v5290_v56  ;;  %v6270_v56 = vld [vmem:[#allocation5_spill] sm:$0xff]  ;;  %v2326_v35 = vpop.permute.xlu0 %2325 }
 0x17f   : > { %4048 = vmatprep.mubr.msk.bf16.mxu1 %vm2341_vm10, %v5468_v18  ;;  %3092 = vmatprep.subr.bf16.mxu0 %v6194_v52  ;;  %v1931_v54 = vsel %vm1913_vm4, 0, %v6270_v56  ;;  %vm2261_vm4 = vcmp.ne.s16.totalorder %v3998_v29, 0  ;;  %v749_v56 = vadd.s32 192, %v4581_v36  ;;  %v1282_v29 = vand.u32 15, %v754_v60 }
 0x180   : > { %4303 = vmatpush2.bf16.msra.mxu1 %v5459_v42  ;;  %v5501_v46 = vsel %vm2341_vm10, %v1931_v54, %v2320_v22 }
 0x181   : > { %2876 = vmatmul.mubr.bf16.gmra.mxu0 %v5293_v61  ;;  %v1247_v59 = vand.u32 15, %v749_v56 }
 0x182   : > { %4074 = vmatprep.mubr.msk.bf16.mxu0 %vm2341_vm10, %v5299_v32  ;;  %3093 = vmatpush1.bf16.msra.mxu0 %v5316_v10  ;;  %v6273_v10 = vld [vmem:[#allocation10_spill] sm:$0xff] }
 0x183   : > { %3094 = vmatprep.subr.bf16.mxu0 %v6194_v52  ;;  %v5506_v25 = vsel %vm2259_vm6, 0, %v6273_v10  ;;  %vm5582_vm6 = vcmp.eq.s32.totalorder %v1254_v49, 15  ;;  %v3999_v10 = vcombine.low %v4633_v55, %v2184_v31  ;;  %vm5603_vm13 = vcmp.eq.s32.totalorder %v1247_v59, 0  ;;  %v6298_v59 = vld [vmem:[#allocation17_spill] sm:$0xff] }
 0x184   : > { %vm2150_vm9 = vmpackc.low %vm5582_vm6, %vm5582_vm6 }
 0x185   : > { %vm1804_vm15 = vmpackc.low %vm5603_vm13, %vm5603_vm13 }
 0x186   : > { %2664 = vmatmul.mubr.bf16.gmra.mxu1 %v5501_v46  ;;  %3095 = vmatpush1.bf16.msra.mxu0 %v5345_v6  ;;  %v6276_v6 = vld [vmem:[#allocation11_spill] sm:$0xff]  ;;  %v1840_v12 = vsel %vm1804_vm15, 65537, %v6194_v52 }
 0x187   : > { %4049 = vmatprep.mubr.msk.bf16.mxu1 %vm2341_vm10, %v5506_v25  ;;  %3104 = vmatprep.subr.bf16.mxu0 %v6194_v52  ;;  %v1932_v19 = vsel %vm1914_vm12, 0, %v6276_v6  ;;  %vm2262_vm12 = vcmp.ne.s16.totalorder %v3999_v10, 0  ;;  %v751_v6 = vadd.s32 208, %v4581_v36  ;;  %v3982_v31 = vcombine.low %v1840_v12, %v4633_v55 }
 0x188   : > { %v5538_v48 = vsel %vm2341_vm10, %v1932_v19, %v2322_v63  ;;  %v6288_v63 = vld [vmem:[#allocation15_spill] sm:$0xff]  ;;  %v5614_v41 = vsel %vm2262_vm12, 0, %v4965_v40  ;;  %v2328_v40 = vpop.permute.xlu1 %2327  ;;  %v1296_v10 = vand.u32 15, %v756_v30 }
 0x189   : > { %2884 = vmatmul.mubr.bf16.gmra.mxu0 %v5348_v7  ;;  %v1934_v27 = vsel %vm1916_vm11, 0, %v6288_v63  ;;  %v1261_v8 = vand.u32 15, %v751_v6  ;;  %vm1918_vm6 = vcmp.ne.s16.totalorder %v3982_v31, 0  ;;  %v755_v63 = vadd.s32 240, %v4581_v36 }
 0x18a   : > { %4075 = vmatprep.mubr.msk.bf16.mxu0 %vm2341_vm10, %v5354_v39  ;;  %3105 = vmatpush2.bf16.msra.mxu0 %v5373_v20  ;;  %v6279_v20 = vld [vmem:[#allocation12_spill] sm:$0xff]  ;;  %v5609_v19 = vsel %vm2341_vm10, %v1934_v27, %v2326_v35  ;;  %v1936_v35 = vsel %vm1918_vm6, 0, %v6298_v59  ;;  %vm5682_vm12 = vcmp.eq.s32.totalorder %v1296_v10, 15 }
 0x18b   : > { %3106 = vmatprep.subr.bf16.mxu0 %v6194_v52  ;;  %v5543_v33 = vsel %vm2260_vm14, 0, %v6279_v20  ;;  %vm5616_vm14 = vcmp.eq.s32.totalorder %v1268_v1, 15  ;;  %vm5636_vm3 = vcmp.eq.s32.totalorder %v1261_v8, 0  ;;  %v1289_v60 = vand.u32 15, %v755_v63  ;;  %vm2156_vm15 = vmpackc.low %vm5682_vm12, %vm5682_vm12 }
 0x18c   : > { %vm2152_vm1 = vmpackc.low %vm5616_vm14, %vm5616_vm14  ;;  %v1310_v8 = vand.u32 15, %v758_v23 }
 0x18d   : > { %v2188_v38 = vsel %vm2152_vm1, 65537, %v6194_v52  ;;  %vm1806_vm5 = vmpackc.low %vm5636_vm3, %vm5636_vm3  ;;  %vm5702_vm1 = vcmp.eq.s32.totalorder %v1289_v60, 0 }
 0x18e   : > { %2672 = vmatmul.mubr.bf16.gmra.mxu1 %v5538_v48  ;;  %3107 = vmatpush2.bf16.msra.mxu0 %v5402_v14  ;;  %v6282_v14 = vld [vmem:[#allocation9_spill] sm:$0xff]  ;;  %v1842_v3 = vsel %vm1806_vm5, 65537, %v6194_v52  ;;  %vm1810_vm3 = vmpackc.low %vm5702_vm1, %vm5702_vm1 }
 0x18f   : > { %4050 = vmatprep.mubr.msk.bf16.mxu1 %vm2341_vm10, %v5543_v33  ;;  %3108 = vmatprep.subr.bf16.mxu0 %v6194_v52  ;;  %v1933_v22 = vsel %vm1915_vm2, 0, %v6282_v14  ;;  %v753_v14 = vadd.s32 224, %v4581_v36 }
 0x190   : > { %v5575_v54 = vsel %vm2341_vm10, %v1933_v22, %v2324_v4  ;;  %v1935_v4 = vsel %vm1917_vm0, 0, %v6293_v43 }
 0x191   : > { %2892 = vmatmul.mubr.bf16.gmra.mxu0 %v5405_v47  ;;  %v5642_v22 = vsel %vm2341_vm10, %v1935_v4, %v2328_v40  ;;  %v1275_v21 = vand.u32 15, %v753_v14  ;;  %v6303_v40 = vld [vmem:[#allocation16_spill] sm:$0xff]  ;;  %v757_v4 = vadd.s32 256, %v4581_v36 }
 0x192   : > { %4076 = vmatprep.mubr.msk.bf16.mxu0 %vm2341_vm10, %v5411_v57  ;;  %3109 = vmatpush2.bf16.msra.mxu0 %v5430_v50  ;;  %v6285_v50 = vld [vmem:[#allocation14_spill] sm:$0xff] }
 0x193   : > { %3110 = vmatprep.subr.bf16.mxu0 %v6194_v52  ;;  %v5580_v9 = vsel %vm2261_vm4, 0, %v6285_v50  ;;  %vm5649_vm4 = vcmp.eq.s32.totalorder %v1282_v29, 15  ;;  %v4001_v50 = vcombine.low %v4633_v55, %v2188_v38  ;;  %v2192_v29 = vsel %vm2156_vm15, 65537, %v6194_v52 }
 0x194   : > { %vm2154_vm8 = vmpackc.low %vm5649_vm4, %vm5649_vm4  ;;  %v4003_v31 = vcombine.low %v4633_v55, %v2192_v29  ;;  %v1303_v56 = vand.u32 15, %v757_v4 }
 0x195   : > { %vm2264_vm11 = vcmp.ne.s16.totalorder %v4001_v50, 0  ;;  %v2190_v11 = vsel %vm2154_vm8, 65537, %v6194_v52  ;;  %v1846_v50 = vsel %vm1810_vm3, 65537, %v6194_v52 }
 0x196   : > { %2680 = vmatmul.mubr.bf16.gmra.mxu1 %v5575_v54  ;;  %3111 = vmatpush2.bf16.msra.mxu0 %v5459_v42  ;;  %v2186_v42 = vsel %vm2150_vm9, 65537, %v6194_v52  ;;  %vm5669_vm9 = vcmp.eq.s32.totalorder %v1275_v21, 0  ;;  %v5680_v62 = vsel %vm2264_vm11, 0, %v4994_v58  ;;  %v4002_v2 = vcombine.low %v4633_v55, %v2190_v11  ;;  %v2332_v58 = vpop.permute.xlu1 %2331 }
 0x197   : > { %4051 = vmatprep.mubr.msk.bf16.mxu1 %vm2341_vm10, %v5580_v9  ;;  %v4000_v20 = vcombine.low %v4633_v55, %v2186_v42  ;;  %v3983_v42 = vcombine.low %v1842_v3, %v4633_v55  ;;  %vm1808_vm13 = vmpackc.low %vm5669_vm9, %vm5669_vm9  ;;  %vm2266_vm6 = vcmp.ne.s16.totalorder %v4003_v31, 0  ;;  %vm1539_vm8 = vcmp.eq.s32.totalorder %v1303_v56, 0 }
 0x198   : > { %vm2265_vm0 = vcmp.ne.s16.totalorder %v4002_v2, 0  ;;  %v3985_v3 = vcombine.low %v1846_v50, %v4633_v55  ;;  %v5733_v10 = vsel %vm2266_vm6, 0, %v5037_v16  ;;  %vm1812_vm11 = vmpackc.low %vm1539_vm8, %vm1539_vm8  ;;  %v6306_v16 = vld [vmem:[#allocation2_spill] sm:$0xff] }
 0x199   : > { %2900 = vmatmul.mubr.bf16.gmra.mxu0 %v5462_v37  ;;  %vm2263_vm2 = vcmp.ne.s16.totalorder %v4000_v20, 0  ;;  %vm1919_vm14 = vcmp.ne.s16.totalorder %v3983_v42, 0  ;;  %v1844_v20 = vsel %vm1808_vm13, 65537, %v6194_v52  ;;  %v5713_v14 = vsel %vm2265_vm0, 0, %v5009_v28 }
 0x19a   : > { %4077 = vmatprep.mubr.msk.bf16.mxu0 %vm2341_vm10, %v5468_v18  ;;  %v5647_v34 = vsel %vm2263_vm2, 0, %v4979_v0  ;;  %v2330_v0 = vpop.permute.xlu0 %2329  ;;  %v1937_v12 = vsel %vm1919_vm14, 0, %v6303_v40  ;;  %v3984_v49 = vcombine.low %v1844_v20, %v4633_v55  ;;  %vm1975_vm2 = vcmp.eq.s32.totalorder %v1310_v8, 15 }
 0x19b   : > { %v5675_v27 = vsel %vm2341_vm10, %v1936_v35, %v2330_v0  ;;  %v5708_v38 = vsel %vm2341_vm10, %v1937_v12, %v2332_v58  ;;  %vm2158_vm5 = vmpackc.low %vm1975_vm2, %vm1975_vm2  ;;  %vm1921_vm9 = vcmp.ne.s16.totalorder %v3985_v3, 0  ;;  %v2336_v35 = vpop.permute.xlu1 %2335  ;;  %v1848_v11 = vsel %vm1812_vm11, 65537, %v6194_v52  ;;  %v4388_v58 = vld [vmem:[%s6129_s5 + $0x18] sm:$0xff]  }
 0x19c   : > { %vm1920_vm4 = vcmp.ne.s16.totalorder %v3984_v49, 0  ;;  %v2194_v21 = vsel %vm2158_vm5, 65537, %v6194_v52  ;;  %v1939_v45 = vsel %vm1921_vm9, 0, %v4997_v26  ;;  %vm2050_vm0 = vcmask 1047552   ;;  %4240 = vmatprep.subr.bf16.mxu0 %v4388_v58  ;;  %v4389_v49 = vld [vmem:[%s6129_s5 + $0x10] sm:$0xff]  }
 0x19d   : > { %v1938_v28 = vsel %vm1920_vm4, 0, %v5012_v24  ;;  %v2028_v24 = vor.u32 %v5026_v44, %v1672_v17  ;;  %v4004_v59 = vcombine.low %v4633_v55, %v2194_v21  ;;  %v5749_v17 = vsel %vm2341_vm10, %v1939_v45, %v2336_v35  ;;  %vm5825_vm2 = vmand %vm2050_vm0, %vm1978_vm7  ;;  %v4391_v35 = vld [vmem:[%s6129_s5] sm:$0xff]  }
 0x19e   : > { %2688 = vmatmul.mubr.bf16.gmra.mxu1 %v5609_v19  ;;  %v2334_v30 = vpop.permute.xlu0 %2333  ;;  %v3986_v44 = vcombine.low %v1848_v11, %v4633_v55  ;;  %v2052_v20 = vsel %vm5825_vm2, %v6306_v16, 0 }
 0x19f   : > { %4052 = vmatprep.mubr.msk.bf16.mxu1 %vm2341_vm10, %v5614_v41  ;;  %v5728_v0 = vsel %vm2341_vm10, %v1938_v28, %v2334_v30  ;;  %v2030_v1 = vsel %vm1978_vm7, %v2028_v24, %v6306_v16  ;;  %vm2267_vm12 = vcmp.ne.s16.totalorder %v4004_v59, 0  ;;  %v4390_v28 = vld [vmem:[%s6129_s5 + $0x8] sm:$0xff]   ;;  %v2340_v21 = vpop.permute.xlu1 %2339 }
 0x1a0   : > { %v5753_v63 = vsel %vm2267_vm12, 0, %v2030_v1  ;;  %vm1922_vm13 = vcmp.ne.s16.totalorder %v3986_v44, 0 }
 0x1a1   : > { %2908 = vmatmul.mubr.bf16.gmra.mxu0 %v5501_v46  ;;  %v1940_v26 = vsel %vm1922_vm13, 0, %v5043_v5 }
 0x1a2   : > { %4078 = vmatprep.mubr.msk.bf16.mxu0 %vm2341_vm10, %v5506_v25  ;;  %v2338_v42 = vpop.permute.xlu0 %2337 }
 0x1a3   : > { %v5762_v6 = vsel %vm2341_vm10, %v1940_v26, %v2338_v42 }
 0x1a6   : > { %2696 = vmatmul.mubr.bf16.gmra.mxu1 %v5642_v22 }
 0x1a7   : > { %4053 = vmatprep.mubr.msk.bf16.mxu1 %vm2341_vm10, %v5647_v34 }
 0x1a9   : > { %2916 = vmatmul.mubr.bf16.gmra.mxu0 %v5538_v48 }
 0x1aa   : > { %4079 = vmatprep.mubr.msk.bf16.mxu0 %vm2341_vm10, %v5543_v33 }
 0x1ae   : > { %2704 = vmatmul.mubr.bf16.gmra.mxu1 %v5675_v27 }
 0x1af   : > { %4054 = vmatprep.mubr.msk.bf16.mxu1 %vm2341_vm10, %v5680_v62 }
 0x1b1   : > { %2924 = vmatmul.mubr.bf16.gmra.mxu0 %v5575_v54 }
 0x1b2   : > { %4080 = vmatprep.mubr.msk.bf16.mxu0 %vm2341_vm10, %v5580_v9 }
 0x1b6   : > { %2712 = vmatmul.mubr.bf16.gmra.mxu1 %v5708_v38 }
 0x1b7   : > { %4055 = vmatprep.mubr.msk.bf16.mxu1 %vm2341_vm10, %v5713_v14 }
 0x1b9   : > { %2932 = vmatmul.mubr.bf16.gmra.mxu0 %v5609_v19 }
 0x1ba   : > { %4081 = vmatprep.mubr.msk.bf16.mxu0 %vm2341_vm10, %v5614_v41 }
 0x1be   : > { %2720 = vmatmul.mubr.bf16.gmra.mxu1 %v5728_v0 }
 0x1bf   : > { %4056 = vmatprep.mubr.msk.bf16.mxu1 %vm2341_vm10, %v5733_v10 }
 0x1c1   : > { %2940 = vmatmul.mubr.bf16.gmra.mxu0 %v5642_v22 }
 0x1c2   : > { %4082 = vmatprep.mubr.msk.bf16.mxu0 %vm2341_vm10, %v5647_v34 }
 0x1c6   : > { %2728 = vmatmul.mubr.bf16.gmra.mxu1 %v5749_v17 }
 0x1c7   : > { %4057 = vmatprep.mubr.msk.bf16.mxu1 %vm2341_vm10, %v5753_v63 }
 0x1c9   : > { %2948 = vmatmul.mubr.bf16.gmra.mxu0 %v5675_v27 }
 0x1ca   : > { %4083 = vmatprep.mubr.msk.bf16.mxu0 %vm2341_vm10, %v5680_v62 }
 0x1ce   : > { %2736 = vmatmul.mubr.bf16.gmra.mxu1 %v5762_v6 }
 0x1cf   : > { %4124 = vmatprep.mubr.msk.bf16.mxu1 %vm2341_vm10, %v5299_v32 }
 0x1d1   : > { %2956 = vmatmul.mubr.bf16.gmra.mxu0 %v5708_v38 }
 0x1d2   : > { %4084 = vmatprep.mubr.msk.bf16.mxu0 %vm2341_vm10, %v5713_v14 }
 0x1d6   : > { %3129 = vmatmul.mubr.bf16.vlgmr.msra.gmra.mxu1 %v5348_v7 }
 0x1d7   : > { %4125 = vmatprep.mubr.msk.bf16.mxu1 %vm2341_vm10, %v5354_v39 }
 0x1d9   : > { %2964 = vmatmul.mubr.bf16.gmra.mxu0 %v5728_v0 }
 0x1da   : > { %4085 = vmatprep.mubr.msk.bf16.mxu0 %vm2341_vm10, %v5733_v10 }
 0x1de   : > { %3137 = vmatmul.mubr.bf16.gmra.mxu1 %v5405_v47 }
 0x1df   : > { %4126 = vmatprep.mubr.msk.bf16.mxu1 %vm2341_vm10, %v5411_v57  ;;  %v759_v57 = vadd.s32 272, %v4581_v36 }
 0x1e1   : > { %2972 = vmatmul.mubr.bf16.gmra.mxu0 %v5749_v17 }
 0x1e2   : > { %4122 = vmatprep.mubr.msk.bf16.mxu0 %vm2341_vm10, %v5150_v53 }
 0x1e6   : > { %3145 = vmatmul.mubr.bf16.gmra.mxu1 %v5462_v37 }
 0x1e7   : > { %4127 = vmatprep.mubr.msk.bf16.mxu1 %vm2341_vm10, %v5468_v18 }
 0x1e9   : > { %3113 = vmatmul.mubr.bf16.vlgmr.msra.gmra.mxu0 %v5231_v13 }
 0x1ea   : > { %4123 = vmatprep.mubr.msk.bf16.mxu0 %vm2341_vm10, %v5237_v51  ;;  %4241 = vmatpush3.bf16.msra.mxu0 %v4388_v58 }
 0x1eb   : > { %4242 = vmatprep.subr.bf16.mxu0 %v4389_v49 }
 0x1ee   : > { %3153 = vmatmul.mubr.bf16.gmra.mxu1 %v5501_v46  ;;  %v1317_v46 = vand.u32 15, %v759_v57  ;;  %4243 = vmatpush3.bf16.msra.mxu0 %v4389_v49 }
 0x1ef   : > { %4128 = vmatprep.mubr.msk.bf16.mxu1 %vm2341_vm10, %v5506_v25  ;;  %4244 = vmatprep.subr.bf16.mxu0 %v4390_v28 }
 0x1f0   : > { %vm5818_vm1 = vcmp.eq.s32.totalorder %v1317_v46, 0 }
 0x1f1   : > { %3121 = vmatmul.mubr.bf16.gmra.mxu0 %v5293_v61  ;;  %v760_v61 = vadd.s32 280, %v4581_v36  ;;  %vm1814_vm3 = vmpackc.low %vm5818_vm1, %vm5818_vm1 }
 0x1f2   : > { %v1850_v8 = vsel %vm1814_vm3, 65537, %v6194_v52  ;;  %4245 = vmatpush3.bf16.msra.mxu0 %v4390_v28 }
 0x1f3   : > { %v1324_v39 = vand.u32 15, %v760_v61  ;;  %4246 = vmatprep.subr.bf16.mxu0 %v4391_v35 }
 0x1f5   : > { %vm1977_vm14 = vcmp.eq.s32.totalorder %v1324_v39, 15 }
 0x1f6   : > { %3161 = vmatmul.mubr.bf16.gmra.mxu1 %v5538_v48  ;;  %vm2160_vm15 = vmpackc.low %vm1977_vm14, %vm1977_vm14  ;;  %4247 = vmatpush3.bf16.msra.mxu0 %v4391_v35 }
 0x1f7   : > { %4129 = vmatprep.mubr.msk.bf16.mxu1 %vm2341_vm10, %v5543_v33 }
 0x1fe   : > { %3169 = vmatmul.mubr.bf16.gmra.mxu1 %v5575_v54  ;;  %v2196_v54 = vsel %vm2160_vm15, 65537, %v6194_v52 }
 0x1ff   : > { %4130 = vmatprep.mubr.msk.bf16.mxu1 %vm2341_vm10, %v5580_v9 }
 0x206   : > { %3177 = vmatmul.mubr.bf16.gmra.mxu1 %v5609_v19 }
 0x207   : > { %4131 = vmatprep.mubr.msk.bf16.mxu1 %vm2341_vm10, %v5614_v41 }
 0x20e   : > { %3185 = vmatmul.mubr.bf16.gmra.mxu1 %v5642_v22  ;;  %v4005_v22 = vcombine.low %v4633_v55, %v2196_v54 }
 0x20f   : > { %4132 = vmatprep.mubr.msk.bf16.mxu1 %vm2341_vm10, %v5647_v34 }
 0x210   : > { %vm2268_vm7 = vcmp.ne.s16.totalorder %v4005_v22, 0 }
 0x213   : > { %v2617_v5 = vpop.f32.mrf.mxu1 }
 0x215   : > { %v2619_v53 = vpop.f32.mrf.mxu1 }
 0x216   : > { %3193 = vmatmul.mubr.bf16.gmra.mxu1 %v5675_v27 }
 0x217   : > { %4133 = vmatprep.mubr.msk.bf16.mxu1 %vm2341_vm10, %v5680_v62  ;;  %v2620_v13 = vpop.f32.mrf.mxu1 }
 0x219   : > { %v2622_v51 = vpop.f32.mrf.mxu1 }
 0x21e   : > { %v2625_v32 = vpop.f32.mrf.mxu1  ;;  %3201 = vmatmul.mubr.bf16.gmra.mxu1 %v5708_v38  ;;  %v2286_v38 = vsel %vm2268_vm7, 0, %v2052_v20 }
 0x21f   : > { %4134 = vmatprep.mubr.msk.bf16.mxu1 %vm2341_vm10, %v5713_v14  ;;  %v3987_v14 = vcombine.low %v1850_v8, %v4633_v55 }
 0x220   : > { %v2627_v7 = vpop.f32.mrf.mxu1 }
 0x221   : > { %vm1923_vm4 = vcmp.ne.s16.totalorder %v3987_v14, 0 }
 0x222   : > { %v2628_v47 = vpop.f32.mrf.mxu1 }
 0x224   : > { %v2630_v37 = vpop.f32.mrf.mxu1 }
 0x226   : > { %v2633_v18 = vpop.f32.mrf.mxu1  ;;  %3209 = vmatmul.mubr.bf16.gmra.mxu1 %v5728_v0 }
 0x227   : > { %4135 = vmatprep.mubr.msk.bf16.mxu1 %vm2341_vm10, %v5733_v10  ;;  %v1941_v10 = vsel %vm1923_vm4, 0, %v5033_v15 }
 0x228   : > { %v2635_v25 = vpop.f32.mrf.mxu1  ;;  %v2412_v11 = vsel %vm2341_vm10, %v1941_v10, %v2340_v21 }
 0x229   : > { %v2853_v33 = vpop.f32.mrf.mxu0 }
 0x22a   : > { %v2636_v48 = vpop.f32.mrf.mxu1  ;;  %v5816_v9 = vadd.f32 %v2853_v33, %v2617_v5 }
 0x22b   : > { %v2855_v41 = vpop.f32.mrf.mxu0 }
 0x22c   : > { %v2638_v19 = vpop.f32.mrf.mxu1 }
 0x22d   : > { %v2856_v27 = vpop.f32.mrf.mxu0 }
 0x22e   : > { %v2641_v34 = vpop.f32.mrf.mxu1  ;;  %3217 = vmatmul.mubr.bf16.gmra.mxu1 %v5749_v17  ;;  %v5832_v23 = vadd.f32 %v2856_v27, %v2620_v13 }
 0x22f   : > { %4136 = vmatprep.mubr.msk.bf16.mxu1 %vm2341_vm10, %v5753_v63  ;;  %v2858_v60 = vpop.f32.mrf.mxu0 }
 0x230   : > { %v2643_v2 = vpop.f32.mrf.mxu1 }
 0x231   : > { %v2861_v12 = vpop.f32.mrf.mxu0 }
 0x232   : > { %v2644_v40 = vpop.f32.mrf.mxu1  ;;  %v5843_v29 = vadd.f32 %v2861_v12, %v2625_v32 }
 0x233   : > { %v2863_v4 = vpop.f32.mrf.mxu0 }
 0x234   : > { %v2646_v43 = vpop.f32.mrf.mxu1 }
 0x235   : > { %v2864_v56 = vpop.f32.mrf.mxu0 }
 0x236   : > { %v2649_v31 = vpop.f32.mrf.mxu1  ;;  %3225 = vmatmul.mubr.bf16.gmra.mxu1 %v5762_v6  ;;  %v5850_v52 = vadd.f32 %v2864_v56, %v2628_v47 }
 0x237   : > { %4137 = vmatprep.mubr.msk.bf16.mxu1 %vm2341_vm10, %v2286_v38  ;;  %v2866_v50 = vpop.f32.mrf.mxu0 }
 0x238   : > { %v2651_v30 = vpop.f32.mrf.mxu1 }
 0x239   : > { %v2869_v55 = vpop.f32.mrf.mxu0 }
 0x23a   : > { %v2652_v0 = vpop.f32.mrf.mxu1  ;;  %v5856_v3 = vadd.f32 %v2869_v55, %v2633_v18 }
 0x23b   : > { %v2871_v59 = vpop.f32.mrf.mxu0 }
 0x23c   : > { %v2654_v24 = vpop.f32.mrf.mxu1 }
 0x23d   : > { %v2872_v1 = vpop.f32.mrf.mxu0 }
 0x23e   : > { %v2657_v16 = vpop.f32.mrf.mxu1  ;;  %3233 = vmatmul.mubr.bf16.gmra.mxu1 %v2412_v11  ;;  %v5863_v45 = vadd.f32 %v2872_v1, %v2636_v48 }
 0x23f   : > { %v2874_v44 = vpop.f32.mrf.mxu0 }
 0x240   : > { %v2659_v17 = vpop.f32.mrf.mxu1 }
 0x241   : > { %v2877_v42 = vpop.f32.mrf.mxu0 }
 0x242   : > { %v2660_v63 = vpop.f32.mrf.mxu1  ;;  %v5865_v15 = vadd.f32 %v2877_v42, %v2641_v34 }
 0x243   : > { %v2879_v6 = vpop.f32.mrf.mxu0 }
 0x244   : > { %v2662_v26 = vpop.f32.mrf.mxu1 }
 0x245   : > { %v2880_v53 = vpop.f32.mrf.mxu0 }
 0x246   : > { %v2665_v5 = vpop.f32.mrf.mxu1  ;;  %v5867_v13 = vadd.f32 %v2880_v53, %v2644_v40 }
 0x247   : > { %v2882_v61 = vpop.f32.mrf.mxu0 }
 0x248   : > { %v2667_v51 = vpop.f32.mrf.mxu1 }
 0x249   : > { %v2885_v7 = vpop.f32.mrf.mxu0 }
 0x24a   : > { %v2668_v32 = vpop.f32.mrf.mxu1  ;;  %v5869_v39 = vadd.f32 %v2885_v7, %v2649_v31 }
 0x24b   : > { %v2887_v57 = vpop.f32.mrf.mxu0 }
 0x24c   : > { %v2670_v47 = vpop.f32.mrf.mxu1 }
 0x24d   : > { %v2888_v18 = vpop.f32.mrf.mxu0 }
 0x24e   : > { %v2673_v37 = vpop.f32.mrf.mxu1  ;;  %v5871_v46 = vadd.f32 %v2888_v18, %v2652_v0 }
 0x24f   : > { %v2890_v48 = vpop.f32.mrf.mxu0 }
 0x250   : > { %v2675_v25 = vpop.f32.mrf.mxu1 }
 0x251   : > { %v2893_v54 = vpop.f32.mrf.mxu0 }
 0x252   : > { %v2676_v33 = vpop.f32.mrf.mxu1  ;;  %v5873_v36 = vadd.f32 %v2893_v54, %v2657_v16 }
 0x253   : > { %v2895_v41 = vpop.f32.mrf.mxu0 }
 0x254   : > { %v2678_v19 = vpop.f32.mrf.mxu1 }
 0x255   : > { %v2896_v34 = vpop.f32.mrf.mxu0 }
 0x256   : > { %v2681_v22 = vpop.f32.mrf.mxu1  ;;  %v5875_v27 = vadd.f32 %v2896_v34, %v2660_v63 }
 0x257   : > { %v2898_v2 = vpop.f32.mrf.mxu0 }
 0x258   : > { %v2683_v62 = vpop.f32.mrf.mxu1 }
 0x259   : > { %v2901_v58 = vpop.f32.mrf.mxu0 }
 0x25a   : > { %v2684_v60 = vpop.f32.mrf.mxu1  ;;  %v5877_v20 = vadd.f32 %v2901_v58, %v2665_v5 }
 0x25b   : > { %v2903_v40 = vpop.f32.mrf.mxu0 }
 0x25c   : > { %v2686_v8 = vpop.f32.mrf.mxu1 }
 0x25d   : > { %v2904_v43 = vpop.f32.mrf.mxu0 }
 0x25e   : > { %v2689_v12 = vpop.f32.mrf.mxu1  ;;  %v5879_v4 = vadd.f32 %v2904_v43, %v2668_v32 }
 0x25f   : > { %v2906_v49 = vpop.f32.mrf.mxu0 }
 0x260   : > { %v2691_v38 = vpop.f32.mrf.mxu1 }
 0x261   : > { %v2909_v31 = vpop.f32.mrf.mxu0 }
 0x262   : > { %v2692_v14 = vpop.f32.mrf.mxu1  ;;  %v5881_v56 = vadd.f32 %v2909_v31, %v2673_v37 }
 0x263   : > { %v2911_v50 = vpop.f32.mrf.mxu0 }
 0x264   : > { %v2694_v30 = vpop.f32.mrf.mxu1 }
 0x265   : > { %v2912_v21 = vpop.f32.mrf.mxu0 }
 0x266   : > { %v2697_v28 = vpop.f32.mrf.mxu1  ;;  %v5883_v0 = vadd.f32 %v2912_v21, %v2676_v33 }
 0x267   : > { %v2914_v10 = vpop.f32.mrf.mxu0 }
 0x268   : > { %v2699_v55 = vpop.f32.mrf.mxu1 }
 0x269   : > { %v2917_v59 = vpop.f32.mrf.mxu0 }
 0x26a   : > { %v2700_v24 = vpop.f32.mrf.mxu1  ;;  %v5885_v35 = vadd.f32 %v2917_v59, %v2681_v22 }
 0x26b   : > { %v2919_v16 = vpop.f32.mrf.mxu0 }
 0x26c   : > { %v2702_v11 = vpop.f32.mrf.mxu1 }
 0x26d   : > { %v2920_v17 = vpop.f32.mrf.mxu0 }
 0x26e   : > { %v2705_v1 = vpop.f32.mrf.mxu1  ;;  %v5887_v44 = vadd.f32 %v2920_v17, %v2684_v60 }
 0x26f   : > { %v2922_v42 = vpop.f32.mrf.mxu0 }
 0x270   : > { %v2707_v63 = vpop.f32.mrf.mxu1 }
 0x271   : > { %v2925_v6 = vpop.f32.mrf.mxu0 }
 0x272   : > { %v2708_v26 = vpop.f32.mrf.mxu1  ;;  %v5889_v5 = vadd.f32 %v2925_v6, %v2689_v12 }
 0x273   : > { %v2927_v51 = vpop.f32.mrf.mxu0 }
 0x274   : > { %v2710_v53 = vpop.f32.mrf.mxu1  ;;  %v5913_v51 = vld [vmem:[%s6128_s4] ss:$0 sm:$0xff] }
 0x275   : > { %v2928_v32 = vpop.f32.mrf.mxu0 }
 0x276   : > { %v2713_v61 = vpop.f32.mrf.mxu1  ;;  %v5891_v7 = vadd.f32 %v2928_v32, %v2692_v14 }
 0x277   : > { %v2930_v57 = vpop.f32.mrf.mxu0 }
 0x278   : > { %v2715_v47 = vpop.f32.mrf.mxu1 }
 0x279   : > { %v2933_v18 = vpop.f32.mrf.mxu0 }
 0x27a   : > { %v2716_v37 = vpop.f32.mrf.mxu1  ;;  %v5893_v25 = vadd.f32 %v2933_v18, %v2697_v28 }
 0x27b   : > { %v2935_v33 = vpop.f32.mrf.mxu0 }
 0x27c   : > { %v2718_v48 = vpop.f32.mrf.mxu1 }
 0x27d   : > { %v2936_v19 = vpop.f32.mrf.mxu0 }
 0x27e   : > { %v2721_v54 = vpop.f32.mrf.mxu1  ;;  %v5895_v41 = vadd.f32 %v2936_v19, %v2700_v24 }
 0x27f   : > { %v2938_v34 = vpop.f32.mrf.mxu0 }
 0x280   : > { %v2723_v22 = vpop.f32.mrf.mxu1 }
 0x281   : > { %v2941_v2 = vpop.f32.mrf.mxu0 }
 0x282   : > { %v2724_v62 = vpop.f32.mrf.mxu1  ;;  %v5897_v60 = vadd.f32 %v2941_v2, %v2705_v1 }
 0x283   : > { %v2943_v8 = vpop.f32.mrf.mxu0 }
 0x284   : > { %v2726_v58 = vpop.f32.mrf.mxu1 }
 0x285   : > { %v2944_v12 = vpop.f32.mrf.mxu0 }
 0x286   : > { %v2729_v40 = vpop.f32.mrf.mxu1  ;;  %v5899_v43 = vadd.f32 %v2944_v12, %v2708_v26 }
 0x287   : > { %v2946_v49 = vpop.f32.mrf.mxu0 }
 0x288   : > { %v2731_v38 = vpop.f32.mrf.mxu1 }
 0x289   : > { %v2949_v31 = vpop.f32.mrf.mxu0 }
 0x28a   : > { %v2732_v14 = vpop.f32.mrf.mxu1  ;;  %v5901_v30 = vadd.f32 %v2949_v31, %v2713_v61 }
 0x28b   : > { %v2951_v28 = vpop.f32.mrf.mxu0 }
 0x28c   : > { %v2734_v50 = vpop.f32.mrf.mxu1 }
 0x28d   : > { %v2952_v55 = vpop.f32.mrf.mxu0 }
 0x28e   : > { %v2737_v21 = vpop.f32.mrf.mxu1  ;;  %v5903_v10 = vadd.f32 %v2952_v55, %v2716_v37 }
 0x28f   : > { %v2954_v59 = vpop.f32.mrf.mxu0 }
 0x290   : > { %v2739_v24 = vpop.f32.mrf.mxu1 }
 0x291   : > { %v2957_v16 = vpop.f32.mrf.mxu0 }
 0x292   : > { %v2740_v11 = vpop.f32.mrf.mxu1  ;;  %v5905_v1 = vadd.f32 %v2957_v16, %v2721_v54 }
 0x293   : > { %v2959_v63 = vpop.f32.mrf.mxu0 }
 0x294   : > { %v2742_v17 = vpop.f32.mrf.mxu1 }
 0x295   : > { %v2960_v42 = vpop.f32.mrf.mxu0 }
 0x296   : > { %v3130_v26 = vpop.f32.mrf.mxu1  ;;  %v5907_v6 = vadd.f32 %v2960_v42, %v2724_v62 }
 0x297   : > { %v3245_v53 = vadd.f32 %v3130_v26, %v5856_v3  ;;  %v2962_v61 = vpop.f32.mrf.mxu0 }
 0x298   : > { %v3132_v32 = vpop.f32.mrf.mxu1 }
 0x299   : > { %v2965_v47 = vpop.f32.mrf.mxu0  ;;  %v3284_v37 = vadd.f32 %v5913_v51, %v3245_v53 }
 0x29a   : > { %v3133_v57 = vpop.f32.mrf.mxu1  ;;  %v5916_v18 = vadd.f32 %v2965_v47, %v2729_v40 }
 0x29b   : > { %v3246_v48 = vadd.f32 %v3133_v57, %v5863_v45  ;;  %v2967_v33 = vpop.f32.mrf.mxu0  ;;  %v3316_v34 = vmax.f32 %v3284_v37, 0.0 }
 0x29c   : > { %v3135_v54 = vpop.f32.mrf.mxu1 }
 0x29d   : > { %v3285_v19 = vadd.f32 %v5913_v51, %v3246_v48  ;;  %v2968_v3 = vpop.f32.mrf.mxu0 }
 0x29e   : > { %v3138_v22 = vpop.f32.mrf.mxu1  ;;  %v5920_v2 = vadd.f32 %v2968_v3, %v2732_v14 }
 0x29f   : > { %v3317_v62 = vmax.f32 %v3285_v19, 0.0  ;;  %v3247_v58 = vadd.f32 %v3138_v22, %v5865_v15  ;;  %v2970_v8 = vpop.f32.mrf.mxu0 }
 0x2a0   : > { %v3140_v12 = vpop.f32.mrf.mxu1 }
 0x2a1   : > { %v5923_v38 = vpack.c.bf16 %v3317_v62, %v3316_v34  ;;  %v2973_v40 = vpop.f32.mrf.mxu0  ;;  %v3286_v45 = vadd.f32 %v5913_v51, %v3247_v58 }
 0x2a2   : > { %v3141_v49 = vpop.f32.mrf.mxu1  ;;  %v5926_v31 = vadd.f32 %v2973_v40, %v2737_v21 }
 0x2a3   : > { %v3248_v50 = vadd.f32 %v3141_v49, %v5867_v13  ;;  %v2975_v28 = vpop.f32.mrf.mxu0  ;;  %v3318_v16 = vmax.f32 %v3286_v45, 0.0 }
 0x2a4   : > { %v3143_v55 = vpop.f32.mrf.mxu1 }
 0x2a5   : > { %v3287_v24 = vadd.f32 %v5913_v51, %v3248_v50  ;;  %v2976_v14 = vpop.f32.mrf.mxu0 }
 0x2a6   : > { %v3146_v59 = vpop.f32.mrf.mxu1  ;;  %v5930_v17 = vadd.f32 %v2976_v14, %v2740_v11 }
 0x2a7   : > { %v3319_v15 = vmax.f32 %v3287_v24, 0.0  ;;  %v3249_v63 = vadd.f32 %v3146_v59, %v5869_v39  ;;  %v2978_v42 = vpop.f32.mrf.mxu0 }
 0x2a8   : > { %v3148_v26 = vpop.f32.mrf.mxu1 }
 0x2a9   : > { %v5933_v53 = vpack.c.bf16 %v3319_v15, %v3318_v16  ;;  %v3288_v21 = vadd.f32 %v5913_v51, %v3249_v63  ;;  %v3114_v61 = vpop.f32.mrf.mxu0 }
 0x2aa   : > { %v3149_v13 = vpop.f32.mrf.mxu1  ;;  %v3241_v32 = vadd.f32 %v3114_v61, %v5816_v9 }
 0x2ab   : > { %v3250_v47 = vadd.f32 %v3149_v13, %v5871_v46  ;;  %v3116_v57 = vpop.f32.mrf.mxu0  ;;  %v3320_v11 = vmax.f32 %v3288_v21, 0.0 }
 0x2ac   : > { %v3151_v37 = vpop.f32.mrf.mxu1  ;;  %v3280_v39 = vadd.f32 %v5913_v51, %v3241_v32 }
 0x2ad   : > { %v3289_v48 = vadd.f32 %v5913_v51, %v3250_v47  ;;  %v3117_v33 = vpop.f32.mrf.mxu0 }
 0x2ae   : > { %v3154_v54 = vpop.f32.mrf.mxu1  ;;  %v3242_v3 = vadd.f32 %v3117_v33, %v5832_v23  ;;  %v3312_v40 = vmax.f32 %v3280_v39, 0.0 }
 0x2af   : > { %v3321_v19 = vmax.f32 %v3289_v48, 0.0  ;;  %v3251_v22 = vadd.f32 %v3154_v54, %v5873_v36  ;;  %v3119_v34 = vpop.f32.mrf.mxu0 }
 0x2b0   : > { %v3156_v62 = vpop.f32.mrf.mxu1  ;;  %v3281_v9 = vadd.f32 %v5913_v51, %v3242_v3 }
 0x2b1   : > { %v3348_v58 = vpack.c.bf16 %v3321_v19, %v3320_v11  ;;  %v3290_v46 = vadd.f32 %v5913_v51, %v3251_v22  ;;  %v3122_v8 = vpop.f32.mrf.mxu0 }
 0x2b2   : > { %v3157_v12 = vpop.f32.mrf.mxu1  ;;  %v3313_v49 = vmax.f32 %v3281_v9, 0.0  ;;  %v3243_v45 = vadd.f32 %v3122_v8, %v5843_v29 }
 0x2b3   : > { %v3252_v50 = vadd.f32 %v3157_v12, %v5875_v27  ;;  %v3124_v28 = vpop.f32.mrf.mxu0  ;;  %v3322_v24 = vmax.f32 %v3290_v46, 0.0 }
 0x2b4   : > { %v3159_v55 = vpop.f32.mrf.mxu1  ;;  %v3344_v23 = vpack.c.bf16 %v3313_v49, %v3312_v40  ;;  %v3282_v16 = vadd.f32 %v5913_v51, %v3243_v45 }
 0x2b5   : > { %v3291_v36 = vadd.f32 %v5913_v51, %v3252_v50  ;;  %v3125_v14 = vpop.f32.mrf.mxu0 }
 0x2b6   : > { %v3162_v59 = vpop.f32.mrf.mxu1  ;;  %v3244_v63 = vadd.f32 %v3125_v14, %v5850_v52  ;;  %4248 = vmatprep.mubr.msk.bf16.mxu0 %vm2341_vm10, %v3344_v23  ;;  %v3314_v13 = vmax.f32 %v3282_v16, 0.0 }
 0x2b7   : > { %v3323_v15 = vmax.f32 %v3291_v36, 0.0  ;;  %v3253_v42 = vadd.f32 %v3162_v59, %v5877_v20  ;;  %v3127_v29 = vpop.f32.mrf.mxu0 }
 0x2b8   : > { %v3164_v26 = vpop.f32.mrf.mxu1  ;;  %v3283_v21 = vadd.f32 %v5913_v51, %v3244_v63 }
 0x2b9   : > { %v3349_v27 = vpack.c.bf16 %v3323_v15, %v3322_v24  ;;  %v3292_v47 = vadd.f32 %v5913_v51, %v3253_v42 }
 0x2ba   : > { %v3165_v61 = vpop.f32.mrf.mxu1  ;;  %v3315_v32 = vmax.f32 %v3283_v21, 0.0 }
 0x2bb   : > { %v3254_v57 = vadd.f32 %v3165_v61, %v5879_v4  ;;  %v3324_v20 = vmax.f32 %v3292_v47, 0.0 }
 0x2bc   : > { %v3167_v37 = vpop.f32.mrf.mxu1  ;;  %v3345_v48 = vpack.c.bf16 %v3315_v32, %v3314_v13 }
 0x2bd   : > { %v3293_v52 = vadd.f32 %v5913_v51, %v3254_v57 }
 0x2be   : > { %v3170_v11 = vpop.f32.mrf.mxu1  ;;  %4249 = vmatmul.mubr.msk.bf16.vlgmr.msra.gmra.mxu0 %vm2341_vm10, %v3345_v48 }
 0x2bf   : > { %v3325_v33 = vmax.f32 %v3293_v52, 0.0  ;;  %v3255_v54 = vadd.f32 %v3170_v11, %v5881_v56  ;;  %4252 = vmatprep.mubr.msk.bf16.mxu0 %vm2341_vm10, %v5923_v38 }
 0x2c0   : > { %v3172_v39 = vpop.f32.mrf.mxu1 }
 0x2c1   : > { %v3350_v19 = vpack.c.bf16 %v3325_v33, %v3324_v20  ;;  %v3294_v22 = vadd.f32 %v5913_v51, %v3255_v54 }
 0x2c2   : > { %v3173_v3 = vpop.f32.mrf.mxu1 }
 0x2c3   : > { %v3256_v4 = vadd.f32 %v3173_v3, %v5883_v0  ;;  %v3326_v46 = vmax.f32 %v3294_v22, 0.0 }
 0x2c4   : > { %v3175_v34 = vpop.f32.mrf.mxu1 }
 0x2c5   : > { %v3295_v62 = vadd.f32 %v5913_v51, %v3256_v4 }
 0x2c6   : > { %v3178_v9 = vpop.f32.mrf.mxu1  ;;  %4253 = vmatmul.mubr.msk.bf16.gmra.mxu0 %vm2341_vm10, %v5933_v53 }
 0x2c7   : > { %v3327_v8 = vmax.f32 %v3295_v62, 0.0  ;;  %v3257_v56 = vadd.f32 %v3178_v9, %v5885_v35  ;;  %4256 = vmatprep.mubr.msk.bf16.mxu0 %vm2341_vm10, %v3348_v58 }
 0x2c8   : > { %v3180_v12 = vpop.f32.mrf.mxu1 }
 0x2c9   : > { %v3351_v38 = vpack.c.bf16 %v3327_v8, %v3326_v46  ;;  %v3296_v49 = vadd.f32 %v5913_v51, %v3257_v56 }
 0x2ca   : > { %v3181_v40 = vpop.f32.mrf.mxu1 }
 0x2cb   : > { %v3258_v0 = vadd.f32 %v3181_v40, %v5887_v44  ;;  %v3328_v55 = vmax.f32 %v3296_v49, 0.0 }
 0x2cc   : > { %v3183_v45 = vpop.f32.mrf.mxu1 }
 0x2cd   : > { %v3297_v50 = vadd.f32 %v5913_v51, %v3258_v0 }
 0x2ce   : > { %v3186_v28 = vpop.f32.mrf.mxu1  ;;  %4257 = vmatmul.mubr.msk.bf16.gmra.mxu0 %vm2341_vm10, %v3349_v27 }
 0x2cf   : > { %v3329_v23 = vmax.f32 %v3297_v50, 0.0  ;;  %v3259_v35 = vadd.f32 %v3186_v28, %v5889_v5  ;;  %4260 = vmatprep.mubr.msk.bf16.mxu0 %vm2341_vm10, %v3350_v19 }
 0x2d0   : > { %v3188_v53 = vpop.f32.mrf.mxu1 }
 0x2d1   : > { %v3352_v58 = vpack.c.bf16 %v3329_v23, %v3328_v55  ;;  %v3298_v24 = vadd.f32 %v5913_v51, %v3259_v35 }
 0x2d2   : > { %v3189_v36 = vpop.f32.mrf.mxu1 }
 0x2d3   : > { %v3260_v14 = vadd.f32 %v3189_v36, %v5891_v7  ;;  %v3330_v15 = vmax.f32 %v3298_v24, 0.0 }
 0x2d4   : > { %v3191_v44 = vpop.f32.mrf.mxu1 }
 0x2d5   : > { %v3299_v59 = vadd.f32 %v5913_v51, %v3260_v14 }
 0x2d6   : > { %v3194_v16 = vpop.f32.mrf.mxu1  ;;  %4261 = vmatmul.mubr.msk.bf16.gmra.mxu0 %vm2341_vm10, %v3351_v38 }
 0x2d7   : > { %v3331_v63 = vmax.f32 %v3299_v59, 0.0  ;;  %v3261_v42 = vadd.f32 %v3194_v16, %v5893_v25  ;;  %4264 = vmatprep.mubr.msk.bf16.mxu0 %vm2341_vm10, %v3352_v58 }
 0x2d8   : > { %v3196_v5 = vpop.f32.mrf.mxu1 }
 0x2d9   : > { %v3353_v29 = vpack.c.bf16 %v3331_v63, %v3330_v15  ;;  %v3300_v27 = vadd.f32 %v5913_v51, %v3261_v42 }
 0x2da   : > { %v3197_v26 = vpop.f32.mrf.mxu1 }
 0x2db   : > { %v3262_v21 = vadd.f32 %v3197_v26, %v5895_v41  ;;  %v3332_v32 = vmax.f32 %v3300_v27, 0.0 }
 0x2dc   : > { %v3199_v7 = vpop.f32.mrf.mxu1 }
 0x2dd   : > { %v3301_v61 = vadd.f32 %v5913_v51, %v3262_v21  ;;  %v3641_v21 = vpop.permute.xlu0 %3640 }
 0x2de   : > { %v3202_v13 = vpop.f32.mrf.mxu1  ;;  %4265 = vmatmul.mubr.msk.bf16.gmra.mxu0 %vm2341_vm10, %v3353_v29 }
 0x2df   : > { %v3333_v47 = vmax.f32 %v3301_v61, 0.0  ;;  %v3263_v57 = vadd.f32 %v3202_v13, %v5897_v60 }
 0x2e0   : > { %v3204_v25 = vpop.f32.mrf.mxu1 }
 0x2e1   : > { %v3354_v37 = vpack.c.bf16 %v3333_v47, %v3332_v32  ;;  %v3302_v52 = vadd.f32 %v5913_v51, %v3263_v57  ;;  %v3645_v7 = vpop.permute.xlu0 %3644 }
 0x2e2   : > { %v3205_v48 = vpop.f32.mrf.mxu1 }
 0x2e3   : > { %v3264_v11 = vadd.f32 %v3205_v48, %v5899_v43  ;;  %4268 = vmatprep.mubr.msk.bf16.mxu0 %vm2341_vm10, %v3354_v37  ;;  %v3334_v54 = vmax.f32 %v3302_v52, 0.0 }
 0x2e4   : > { %v3207_v41 = vpop.f32.mrf.mxu1 }
 0x2e5   : > { %v3303_v20 = vadd.f32 %v5913_v51, %v3264_v11  ;;  %v3649_v13 = vpop.permute.xlu0 %3648 }
 0x2e6   : > { %v3210_v33 = vpop.f32.mrf.mxu1 }
 0x2e7   : > { %v3335_v39 = vmax.f32 %v3303_v20, 0.0  ;;  %v3265_v19 = vadd.f32 %v3210_v33, %v5901_v30 }
 0x2e8   : > { %v3212_v60 = vpop.f32.mrf.mxu1 }
 0x2e9   : > { %v3355_v3 = vpack.c.bf16 %v3335_v39, %v3334_v54  ;;  %v3304_v4 = vadd.f32 %v5913_v51, %v3265_v19  ;;  %v3653_v47 = vpop.permute.xlu0 %3652 }
 0x2ea   : > { %v3213_v22 = vpop.f32.mrf.mxu1 }
 0x2eb   : > { %v3266_v34 = vadd.f32 %v3213_v22, %v5903_v10  ;;  %4269 = vmatmul.mubr.msk.bf16.gmra.mxu0 %vm2341_vm10, %v3355_v3  ;;  %v3336_v46 = vmax.f32 %v3304_v4, 0.0 }
 0x2ec   : > { %v3215_v43 = vpop.f32.mrf.mxu1 }
 0x2ed   : > { %v3305_v62 = vadd.f32 %v5913_v51, %v3266_v34  ;;  %v3657_v11 = vpop.permute.xlu0 %3656 }
 0x2ee   : > { %v3218_v9 = vpop.f32.mrf.mxu1 }
 0x2ef   : > { %v3337_v8 = vmax.f32 %v3305_v62, 0.0  ;;  %v3267_v56 = vadd.f32 %v3218_v9, %v5905_v1 }
 0x2f0   : > { %v3220_v12 = vpop.f32.mrf.mxu1 }
 0x2f1   : > { %v3356_v38 = vpack.c.bf16 %v3337_v8, %v3336_v46  ;;  %v3306_v40 = vadd.f32 %v5913_v51, %v3267_v56  ;;  %v3661_v9 = vpop.permute.xlu0 %3660 }
 0x2f2   : > { %v3221_v30 = vpop.f32.mrf.mxu1 }
 0x2f3   : > { %v3268_v49 = vadd.f32 %v3221_v30, %v5907_v6  ;;  %4272 = vmatprep.mubr.msk.bf16.mxu0 %vm2341_vm10, %v3356_v38  ;;  %v3338_v50 = vmax.f32 %v3306_v40, 0.0 }
 0x2f4   : > { %v3223_v10 = vpop.f32.mrf.mxu1 }
 0x2f5   : > { %v3307_v0 = vadd.f32 %v5913_v51, %v3268_v49 }
 0x2f6   : > { %v3226_v45 = vpop.f32.mrf.mxu1 }
 0x2f7   : > { %v3339_v28 = vmax.f32 %v3307_v0, 0.0  ;;  %v3269_v55 = vadd.f32 %v3226_v45, %v5916_v18 }
 0x2f8   : > { %v3228_v23 = vpop.f32.mrf.mxu1 }
 0x2f9   : > { %v3357_v35 = vpack.c.bf16 %v3339_v28, %v3338_v50  ;;  %v3308_v53 = vadd.f32 %v5913_v51, %v3269_v55  ;;  %v3665_v55 = vpop.permute.xlu0 %3664 }
 0x2fa   : > { %v3229_v1 = vpop.f32.mrf.mxu1 }
 0x2fb   : > { %v3270_v58 = vadd.f32 %v3229_v1, %v5920_v2  ;;  %4273 = vmatmul.mubr.msk.bf16.gmra.mxu0 %vm2341_vm10, %v3357_v35  ;;  %v3340_v14 = vmax.f32 %v3308_v53, 0.0 }
 0x2fc   : > { %v3231_v6 = vpop.f32.mrf.mxu1 }
 0x2fd   : > { %v3309_v36 = vadd.f32 %v5913_v51, %v3270_v58 }
 0x2fe   : > { %v3234_v24 = vpop.f32.mrf.mxu1 }
 0x2ff   : > { %v3341_v44 = vmax.f32 %v3309_v36, 0.0  ;;  %v3271_v59 = vadd.f32 %v3234_v24, %v5926_v31  ;;  %v3643_v31 = vpop.permute.xlu1 %3642 }
 0x300   : > { %v3236_v16 = vpop.f32.mrf.mxu1 }
 0x301   : > { %v3358_v15 = vpack.c.bf16 %v3341_v44, %v3340_v14  ;;  %v3310_v63 = vadd.f32 %v5913_v51, %v3271_v59 }
 0x302   : > { %v3237_v18 = vpop.f32.mrf.mxu1 }
 0x303   : > { %v3272_v42 = vadd.f32 %v3237_v18, %v5930_v17  ;;  %4276 = vmatprep.mubr.msk.bf16.mxu0 %vm2341_vm10, %v3358_v15  ;;  %v3342_v29 = vmax.f32 %v3310_v63, 0.0  ;;  %v3647_v61 = vpop.permute.xlu1 %3646  ;;  %v6011_v17 = vld [vmem:[%s6130_s6] ss:$0 sm:$0xff]  ;;  %v3669_v18 = vpop.permute.xlu0 %3668 }
 0x304   : > { %v3239_v2 = vpop.f32.mrf.mxu1 }
 0x305   : > { %v3311_v5 = vadd.f32 %v5913_v51, %v3272_v42 }
 0x307   : > { %v3343_v26 = vmax.f32 %v3311_v5, 0.0  ;;  %v3651_v32 = vpop.permute.xlu1 %3650 }
 0x309   : > { %v3359_v27 = vpack.c.bf16 %v3343_v26, %v3342_v29 }
 0x30b   : > { %4277 = vmatmul.mubr.msk.bf16.gmra.mxu0 %vm2341_vm10, %v3359_v27  ;;  %v3655_v25 = vpop.permute.xlu1 %3654  ;;  %vm3800_vm10 = vcmask 64512  }
 0x30f   : > { %v3659_v22 = vpop.permute.xlu1 %3658 }
 0x313   : > { %v3663_v10 = vpop.permute.xlu1 %3662 }
 0x317   : > { %v3667_v14 = vpop.permute.xlu1 %3666 }
 0x37e   : > { %v4250_v57 = vpop.f32.mrf.mxu0 }
 0x37f   : > { %v3490_v51 = vadd.f32 %v4250_v57, %v6011_v17 }
 0x380   : > { %v3481_v37 = vpop.f32.mrf.mxu0 }
 0x381   : > { %v3738_v48 = vadd.f32 %v3645_v7, %v3490_v51  ;;  %v3482_v52 = vadd.f32 %v6011_v17, %v3481_v37 }
 0x382   : > { %v4251_v41 = vpop.f32.mrf.mxu0 }
 0x383   : > { %v3770_v20 = vmax.f32 %v3738_v48, 0.0  ;;  %v3736_v33 = vadd.f32 %v3641_v21, %v3482_v52  ;;  %v3493_v54 = vadd.f32 %v4251_v41, %v6011_v17 }
 0x384   : > { %v3484_v39 = vpop.f32.mrf.mxu0 }
 0x385   : > { %3803 = vst.msk [vmem:[%s6019_s29 + $0x10] sm:$0xff] %vm3800_vm10, %v3770_v20  ;;  %v3768_v19 = vmax.f32 %v3736_v33, 0.0  ;;  %v3739_v60 = vadd.f32 %v3647_v61, %v3493_v54  ;;  %v3485_v3 = vadd.f32 %v6011_v17, %v3484_v39 }
 0x386   : > { %v4254_v4 = vpop.f32.mrf.mxu0 }
 0x387   : > { %3801 = vst.msk [vmem:[%s6019_s29] sm:$0xff] %vm3800_vm10, %v3768_v19  ;;  %v3771_v34 = vmax.f32 %v3739_v60, 0.0  ;;  %v3737_v43 = vadd.f32 %v3643_v31, %v3485_v3  ;;  %v3506_v62 = vadd.f32 %v4254_v4, %v6011_v17  ;;  %v3671_v31 = vpop.permute.xlu1 %3670 }
 0x388   : > { %v3497_v46 = vpop.f32.mrf.mxu0 }
 0x389   : > { %3804 = vst.msk [vmem:[%s6019_s29 + $0x18] sm:$0xff] %vm3800_vm10, %v3771_v34  ;;  %v3769_v8 = vmax.f32 %v3737_v43, 0.0  ;;  %v3742_v56 = vadd.f32 %v3653_v47, %v3506_v62  ;;  %v3498_v12 = vadd.f32 %v6011_v17, %v3497_v46  ;;  %v3673_v47 = vpop.permute.xlu0 %3672 }
 0x38a   : > { %v4255_v38 = vpop.f32.mrf.mxu0 }
 0x38b   : > { %3802 = vst.msk [vmem:[%s6019_s29 + $0x8] sm:$0xff] %vm3800_vm10, %v3769_v8  ;;  %v3774_v30 = vmax.f32 %v3742_v56, 0.0  ;;  %v3740_v40 = vadd.f32 %v3649_v13, %v3498_v12  ;;  %v3509_v49 = vadd.f32 %v4255_v38, %v6011_v17  ;;  %v3675_v20 = vpop.permute.xlu1 %3674 }
 0x38c   : > { %v3500_v0 = vpop.f32.mrf.mxu0 }
 0x38d   : > { %3807 = vst.msk [vmem:[%s6019_s29 + $0x30] sm:$0xff] %vm3800_vm10, %v3774_v30  ;;  %v3772_v45 = vmax.f32 %v3740_v40, 0.0  ;;  %v3743_v50 = vadd.f32 %v3655_v25, %v3509_v49  ;;  %v3501_v28 = vadd.f32 %v6011_v17, %v3500_v0  ;;  %v3677_v60 = vpop.permute.xlu0 %3676 }
 0x38e   : > { %v4258_v23 = vpop.f32.mrf.mxu0 }
 0x38f   : > { %3805 = vst.msk [vmem:[%s6019_s29 + $0x20] sm:$0xff] %vm3800_vm10, %v3772_v45  ;;  %v3775_v35 = vmax.f32 %v3743_v50, 0.0  ;;  %v3741_v1 = vadd.f32 %v3651_v32, %v3501_v28  ;;  %v3522_v53 = vadd.f32 %v4258_v23, %v6011_v17  ;;  %v3679_v8 = vpop.permute.xlu1 %3678 }
 0x390   : > { %v3513_v58 = vpop.f32.mrf.mxu0 }
 0x391   : > { %3808 = vst.msk [vmem:[%s6019_s29 + $0x38] sm:$0xff] %vm3800_vm10, %v3775_v35  ;;  %v3773_v6 = vmax.f32 %v3741_v1, 0.0  ;;  %v3746_v36 = vadd.f32 %v3661_v9, %v3522_v53  ;;  %v3514_v24 = vadd.f32 %v6011_v17, %v3513_v58  ;;  %v3681_v40 = vpop.permute.xlu0 %3680 }
 0x392   : > { %v4259_v44 = vpop.f32.mrf.mxu0 }
 0x393   : > { %3806 = vst.msk [vmem:[%s6019_s29 + $0x28] sm:$0xff] %vm3800_vm10, %v3773_v6  ;;  %v3778_v59 = vmax.f32 %v3746_v36, 0.0  ;;  %v3744_v16 = vadd.f32 %v3657_v11, %v3514_v24  ;;  %v3525_v15 = vadd.f32 %v4259_v44, %v6011_v17  ;;  %v3683_v45 = vpop.permute.xlu1 %3682 }
 0x394   : > { %v3516_v63 = vpop.f32.mrf.mxu0 }
 0x395   : > { %3811 = vst.msk [vmem:[%s6019_s29 + $0x50] sm:$0xff] %vm3800_vm10, %v3778_v59  ;;  %v3776_v42 = vmax.f32 %v3744_v16, 0.0  ;;  %v3747_v2 = vadd.f32 %v3663_v10, %v3525_v15  ;;  %v3517_v5 = vadd.f32 %v6011_v17, %v3516_v63 }
 0x396   : > { %v4262_v29 = vpop.f32.mrf.mxu0 }
 0x397   : > { %3809 = vst.msk [vmem:[%s6019_s29 + $0x40] sm:$0xff] %vm3800_vm10, %v3776_v42  ;;  %v3779_v26 = vmax.f32 %v3747_v2, 0.0  ;;  %v3745_v27 = vadd.f32 %v3659_v22, %v3517_v5  ;;  %v3538_v21 = vadd.f32 %v4262_v29, %v6011_v17  ;;  %v3687_v24 = vpop.permute.xlu1 %3686 }
 0x398   : > { %v3529_v7 = vpop.f32.mrf.mxu0 }
 0x399   : > { %3812 = vst.msk [vmem:[%s6019_s29 + $0x58] sm:$0xff] %vm3800_vm10, %v3779_v26  ;;  %v3777_v61 = vmax.f32 %v3745_v27, 0.0  ;;  %v3750_v13 = vadd.f32 %v3669_v18, %v3538_v21  ;;  %v3530_v32 = vadd.f32 %v6011_v17, %v3529_v7 }
 0x39a   : > { %v4263_v57 = vpop.f32.mrf.mxu0 }
 0x39b   : > { %3810 = vst.msk [vmem:[%s6019_s29 + $0x48] sm:$0xff] %vm3800_vm10, %v3777_v61  ;;  %v3782_v51 = vmax.f32 %v3750_v13, 0.0  ;;  %v3748_v25 = vadd.f32 %v3665_v55, %v3530_v32  ;;  %v3541_v37 = vadd.f32 %v4263_v57, %v6011_v17  ;;  %v3685_v55 = vpop.permute.xlu0 %3684  ;;  %v3691_v2 = vpop.permute.xlu1 %3690 }
 0x39c   : > { %v3532_v48 = vpop.f32.mrf.mxu0 }
 0x39d   : > { %3815 = vst.msk [vmem:[%s6019_s29 + $0x70] sm:$0xff] %vm3800_vm10, %v3782_v51  ;;  %v3780_v52 = vmax.f32 %v3748_v25, 0.0  ;;  %v3751_v11 = vadd.f32 %v3671_v31, %v3541_v37  ;;  %v3533_v41 = vadd.f32 %v6011_v17, %v3532_v48 }
 0x39e   : > { %v4266_v33 = vpop.f32.mrf.mxu0 }
 0x39f   : > { %3813 = vst.msk [vmem:[%s6019_s29 + $0x60] sm:$0xff] %vm3800_vm10, %v3780_v52  ;;  %v3783_v54 = vmax.f32 %v3751_v11, 0.0  ;;  %v3749_v39 = vadd.f32 %v3667_v14, %v3533_v41  ;;  %v3554_v19 = vadd.f32 %v4266_v33, %v6011_v17  ;;  %v3689_v42 = vpop.permute.xlu0 %3688 }
 0x3a0   : > { %v3545_v3 = vpop.f32.mrf.mxu0 }
 0x3a1   : > { %3816 = vst.msk [vmem:[%s6019_s29 + $0x78] sm:$0xff] %vm3800_vm10, %v3783_v54  ;;  %v3781_v22 = vmax.f32 %v3749_v39, 0.0  ;;  %v3754_v4 = vadd.f32 %v3677_v60, %v3554_v19  ;;  %v3546_v34 = vadd.f32 %v6011_v17, %v3545_v3 }
 0x3a2   : > { %v4267_v43 = vpop.f32.mrf.mxu0 }
 0x3a3   : > { %3814 = vst.msk [vmem:[%s6019_s29 + $0x68] sm:$0xff] %vm3800_vm10, %v3781_v22  ;;  %v3786_v62 = vmax.f32 %v3754_v4, 0.0  ;;  %v3752_v9 = vadd.f32 %v3673_v47, %v3546_v34  ;;  %v3557_v46 = vadd.f32 %v4267_v43, %v6011_v17  ;;  %v3693_v26 = vpop.permute.xlu0 %3692  ;;  %v3695_v47 = vpop.permute.xlu1 %3694 }
 0x3a4   : > { %v3548_v56 = vpop.f32.mrf.mxu0 }
 0x3a5   : > { %3819 = vst.msk [vmem:[%s6019_s29 + $0x90] sm:$0xff] %vm3800_vm10, %v3786_v62  ;;  %v3784_v12 = vmax.f32 %v3752_v9, 0.0  ;;  %v3755_v38 = vadd.f32 %v3679_v8, %v3557_v46  ;;  %v3549_v30 = vadd.f32 %v6011_v17, %v3548_v56 }
 0x3a7   : > { %3817 = vst.msk [vmem:[%s6019_s29 + $0x80] sm:$0xff] %vm3800_vm10, %v3784_v12  ;;  %v3787_v49 = vmax.f32 %v3755_v38, 0.0  ;;  %v3753_v10 = vadd.f32 %v3675_v20, %v3549_v30  ;;  %v3697_v41 = vpop.permute.xlu0 %3696  ;;  %v3699_v20 = vpop.permute.xlu1 %3698 }
 0x3a9   : > { %3820 = vst.msk [vmem:[%s6019_s29 + $0x98] sm:$0xff] %vm3800_vm10, %v3787_v49  ;;  %v3785_v0 = vmax.f32 %v3753_v10, 0.0 }
 0x3ab   : > { %v4270_v50 = vpop.f32.mrf.mxu0  ;;  %3818 = vst.msk [vmem:[%s6019_s29 + $0x88] sm:$0xff] %vm3800_vm10, %v3785_v0  ;;  %v3701_v39 = vpop.permute.xlu0 %3700 }
 0x3ac   : > { %v3570_v28 = vadd.f32 %v4270_v50, %v6011_v17  ;;  %v3703_v62 = vpop.permute.xlu1 %3702 }
 0x3ad   : > { %v3561_v23 = vpop.f32.mrf.mxu0 }
 0x3ae   : > { %v3758_v35 = vadd.f32 %v3685_v55, %v3570_v28  ;;  %v3562_v1 = vadd.f32 %v6011_v17, %v3561_v23 }
 0x3af   : > { %v4271_v53 = vpop.f32.mrf.mxu0 }
 0x3b0   : > { %v3790_v58 = vmax.f32 %v3758_v35, 0.0  ;;  %v3756_v6 = vadd.f32 %v3681_v40, %v3562_v1  ;;  %v3573_v36 = vadd.f32 %v4271_v53, %v6011_v17 }
 0x3b1   : > { %v3564_v14 = vpop.f32.mrf.mxu0 }
 0x3b2   : > { %3823 = vst.msk [vmem:[%s6019_s29 + $0xb0] sm:$0xff] %vm3800_vm10, %v3790_v58  ;;  %v3788_v44 = vmax.f32 %v3756_v6, 0.0  ;;  %v3759_v59 = vadd.f32 %v3687_v24, %v3573_v36  ;;  %v3565_v16 = vadd.f32 %v6011_v17, %v3564_v14 }
 0x3b4   : > { %3821 = vst.msk [vmem:[%s6019_s29 + $0xa0] sm:$0xff] %vm3800_vm10, %v3788_v44  ;;  %v3791_v15 = vmax.f32 %v3759_v59, 0.0  ;;  %v3757_v18 = vadd.f32 %v3683_v45, %v3565_v16 }
 0x3b6   : > { %3824 = vst.msk [vmem:[%s6019_s29 + $0xb8] sm:$0xff] %vm3800_vm10, %v3791_v15  ;;  %v3789_v63 = vmax.f32 %v3757_v18, 0.0 }
 0x3b8   : > { %3822 = vst.msk [vmem:[%s6019_s29 + $0xa8] sm:$0xff] %vm3800_vm10, %v3789_v63 }
 0x3bb   : > { %v4274_v5 = vpop.f32.mrf.mxu0 }
 0x3bc   : > { %v3586_v29 = vadd.f32 %v4274_v5, %v6011_v17 }
 0x3bd   : > { %v3577_v27 = vpop.f32.mrf.mxu0 }
 0x3be   : > { %v3762_v21 = vadd.f32 %v3693_v26, %v3586_v29  ;;  %v3578_v31 = vadd.f32 %v6011_v17, %v3577_v27 }
 0x3bf   : > { %v4275_v7 = vpop.f32.mrf.mxu0 }
 0x3c0   : > { %v3794_v61 = vmax.f32 %v3762_v21, 0.0  ;;  %v3760_v13 = vadd.f32 %v3689_v42, %v3578_v31  ;;  %v3589_v32 = vadd.f32 %v4275_v7, %v6011_v17 }
 0x3c1   : > { %v3580_v57 = vpop.f32.mrf.mxu0 }
 0x3c2   : > { %3827 = vst.msk [vmem:[%s6019_s29 + $0xd0] sm:$0xff] %vm3800_vm10, %v3794_v61  ;;  %v3792_v51 = vmax.f32 %v3760_v13, 0.0  ;;  %v3763_v25 = vadd.f32 %v3695_v47, %v3589_v32  ;;  %v3581_v37 = vadd.f32 %v6011_v17, %v3580_v57 }
 0x3c4   : > { %3825 = vst.msk [vmem:[%s6019_s29 + $0xc0] sm:$0xff] %vm3800_vm10, %v3792_v51  ;;  %v3795_v48 = vmax.f32 %v3763_v25, 0.0  ;;  %v3761_v52 = vadd.f32 %v3691_v2, %v3581_v37 }
 0x3c6   : > { %3828 = vst.msk [vmem:[%s6019_s29 + $0xd8] sm:$0xff] %vm3800_vm10, %v3795_v48  ;;  %v3793_v11 = vmax.f32 %v3761_v52, 0.0 }
 0x3c8   : > { %3826 = vst.msk [vmem:[%s6019_s29 + $0xc8] sm:$0xff] %vm3800_vm10, %v3793_v11 }
 0x3cb   : > { %v4278_v33 = vpop.f32.mrf.mxu0 }
 0x3cc   : > { %v3602_v54 = vadd.f32 %v4278_v33, %v6011_v17 }
 0x3cd   : > { %v3593_v19 = vpop.f32.mrf.mxu0 }
 0x3ce   : > { %v3766_v60 = vadd.f32 %v3701_v39, %v3602_v54  ;;  %v3594_v3 = vadd.f32 %v6011_v17, %v3593_v19 }
 0x3cf   : > { %v4279_v22 = vpop.f32.mrf.mxu0 }
 0x3d0   : > { %v3798_v4 = vmax.f32 %v3766_v60, 0.0  ;;  %v3764_v34 = vadd.f32 %v3697_v41, %v3594_v3  ;;  %v3605_v43 = vadd.f32 %v4279_v22, %v6011_v17 }
 0x3d1   : > { %v3596_v9 = vpop.f32.mrf.mxu0 }
 0x3d2   : > { %3831 = vst.msk [vmem:[%s6019_s29 + $0xf0] sm:$0xff] %vm3800_vm10, %v3798_v4  ;;  %v3796_v46 = vmax.f32 %v3764_v34, 0.0  ;;  %v3767_v8 = vadd.f32 %v3703_v62, %v3605_v43  ;;  %v3597_v56 = vadd.f32 %v6011_v17, %v3596_v9 }
 0x3d4   : > { %3829 = vst.msk [vmem:[%s6019_s29 + $0xe0] sm:$0xff] %vm3800_vm10, %v3796_v46  ;;  %v3799_v12 = vmax.f32 %v3767_v8, 0.0  ;;  %v3765_v38 = vadd.f32 %v3699_v20, %v3597_v56 }
 0x3d6   : > { %3832 = vst.msk [vmem:[%s6019_s29 + $0xf8] sm:$0xff] %vm3800_vm10, %v3799_v12  ;;  %v3797_v30 = vmax.f32 %v3765_v38, 0.0 }
 0x3d8   : > { %3830 = vst.msk [vmem:[%s6019_s29 + $0xe8] sm:$0xff] %vm3800_vm10, %v3797_v30 }
 0x3d9 PF: > { %s17_s26 = sadd.s32 1, %s4414_s26   ;;  %s6311_s24 = smov %s4410_s25 }
 0x3da   : > { %p14_p5 = scmp.ge.s32.totalorder %s17_s26, 4   ;;  %s6312_s25 = smov %s6314_s27 }
 0x3dc   :  { %16 = sbr.rel (!%p14_p5) target bundleno = 2 (0x2), region = 80 }

</bundles_post_ra>
